<compile_context>
chip_gen: v7x
topology: tpu7x:2x2x1
jax: 0.10.0
libtpu: 0.0.40
codegen_flags: <defaults>
</compile_context>

<pallas_src>
import functools

import jax
import jax.numpy as jnp
from jax import lax
from jax.experimental import pallas as pl
from jax.experimental.pallas import tpu as pltpu


def _mbconv_kernel(
    # ---- inputs ----
    x_ref, w_exp_ref, g0_ref, b0_ref, w_dw_ref, g1_ref, b1_ref,
    w_ser_ref, b_ser_ref, w_see_ref, b_see_ref, w_proj_ref, g2_ref, b2_ref,
    seg_ref, segt_ref, maskl_ref, maskr_ref,
    # ---- output ----
    out_ref,
    # ---- scratch ----
    s0_ref, q0_ref, s1_ref, q1_ref, s2_ref, q2_ref,
    sc0_ref, sh0_ref, sc1_ref, sh1_ref, sc2_ref, sh2_ref,
    h0c_ref, h1c_ref, h2c_ref,
    *, L, TILE, n_cols, eps, has_residual, matmul_dtype):
  """One MBConv stage per grid phase; grid = (4 phases, batch tiles)."""
  phase = pl.program_id(0)          # outermost (slowest) grid axis
  bt = pl.program_id(1)             # batch tile (innermost)
  inv_n = 1.0 / float(n_cols)       # 1 / (B * L): train-mode BN normalizer

  def mm(a, b):                     # big 1x1 convs: bf16/f32 operands, f32 acc
    return jnp.dot(a.astype(matmul_dtype), b.astype(matmul_dtype),
                   preferred_element_type=jnp.float32)

  def mm32(a, b):                   # tiny SE / pooling matmuls: stay f32
    return jnp.dot(a, b, preferred_element_type=jnp.float32)

  def sigmoid(v):                   # tanh form -> EUP slot, cannot overflow
    return 0.5 * (jnp.tanh(0.5 * v) + 1.0)

  def swish(v):
    return v * sigmoid(v)

  def accum_stats(v, s_ref, q_ref):
    s_ref[...] += jnp.sum(v, axis=1, keepdims=True)
    q_ref[...] += jnp.sum(v * v, axis=1, keepdims=True)

  def fold_bn(s_ref, q_ref, g_ref, bias_ref, sc_ref, sh_ref):
    mu = s_ref[...] * inv_n
    var = jnp.maximum(q_ref[...] * inv_n - mu * mu, 0.0)   # guard fp cancellation
    scale = g_ref[...] * lax.rsqrt(var + eps)
    sc_ref[...] = scale
    sh_ref[...] = bias_ref[...] - scale * mu

  # ---- zero all stat accumulators on the very first grid step ----
  @pl.when((phase == 0) & (bt == 0))
  def _():
    for r in (s0_ref, q0_ref, s1_ref, q1_ref, s2_ref, q2_ref):
      r[...] = jnp.zeros_like(r)

  # ========= phase 0: expand 1x1 conv, BN0 stats, cache h0 =========
  @pl.when(phase == 0)
  def _():
    h0 = mm(w_exp_ref[...], x_ref[...])                       # (C_exp, TILE)
    h0c_ref[bt] = h0
    accum_stats(h0, s0_ref, q0_ref)

  # ========= phase 1: BN0+swish, depthwise conv, BN1 stats, cache h1 =========
  @pl.when((phase == 1) & (bt == 0))
  def _():
    fold_bn(s0_ref, q0_ref, g0_ref, b0_ref, sc0_ref, sh0_ref)

  @pl.when(phase == 1)
  def _():
    a0 = swish(h0c_ref[bt] * sc0_ref[...] + sh0_ref[...])     # (C_exp, TILE)
    # depthwise k=3, stride=1, pad=1 along the packed lane axis; precomputed
    # 0/1 masks zero the per-batch-segment boundaries (conv zero-padding).
    if TILE % 128 == 0:
      left = pltpu.roll(a0, 1, axis=1)                        # a0[l-1] (XLU)
      right = pltpu.roll(a0, TILE - 1, axis=1)                # a0[l+1]
    else:
      # lane extent not 128-aligned (tiny demo shapes): slice-concat shift;
      # the row still fits in a single padded vreg either way.
      left = jnp.concatenate([a0[:, :1], a0[:, :-1]], axis=1)
      right = jnp.concatenate([a0[:, 1:], a0[:, -1:]], axis=1)
    w_dw = w_dw_ref[...]                                      # (C_exp, 3)
    h1 = (w_dw[:, 0:1] * (left * maskl_ref[...])
          + w_dw[:, 1:2] * a0
          + w_dw[:, 2:3] * (right * maskr_ref[...]))
    h1c_ref[bt] = h1
    accum_stats(h1, s1_ref, q1_ref)

  # ========= phase 2: BN1+swish, squeeze-excite, project conv, BN2 stats =====
  @pl.when((phase == 2) & (bt == 0))
  def _():
    fold_bn(s1_ref, q1_ref, g1_ref, b1_ref, sc1_ref, sh1_ref)

  @pl.when(phase == 2)
  def _():
    a1 = swish(h1c_ref[bt] * sc1_ref[...] + sh1_ref[...])     # (C_exp, TILE)
    # squeeze-excite, batched over the Bt batch segments in this tile
    pooled = mm32(a1, segt_ref[...])                          # (C_exp, Bt) mean
    se = jnp.maximum(mm32(w_ser_ref[...], pooled) + b_ser_ref[...], 0.0)
    se = sigmoid(mm32(w_see_ref[...], se) + b_see_ref[...])   # (C_exp, Bt)
    a1 = a1 * mm32(se, seg_ref[...])                          # per-segment bcast
    h2 = mm(w_proj_ref[...], a1)                              # (C_out, TILE)
    h2c_ref[bt] = h2
    accum_stats(h2, s2_ref, q2_ref)

  # ========= phase 3: BN2 (+ residual) — the only phase that writes out ======
  @pl.when((phase == 3) & (bt == 0))
  def _():
    fold_bn(s2_ref, q2_ref, g2_ref, b2_ref, sc2_ref, sh2_ref)

  @pl.when(phase == 3)
  def _():
    out = h2c_ref[bt] * sc2_ref[...] + sh2_ref[...]           # BN2 as one FMA
    if has_residual:
      out = out + x_ref[...]                                  # fused residual
    out_ref[...] = out


def mbconv_forward(x_ncl, p, *, stride, has_residual,
                   matmul_dtype=jnp.bfloat16, max_tile_cols=512):
  """x_ncl: (B, C_in, L) float32, PyTorch NCL convention."""
  # TODO(synk): stride > 1 depthwise downsampling is not implemented.
  assert stride == 1, "kernel implements stride=1 only"
  B, C_in, L = x_ncl.shape
  C_exp = p["w_exp"].shape[0]
  C_out = p["w_proj"].shape[0]
  n_cols = B * L

  # ---- how many whole batch elements go into one lane-dense tile ----
  if n_cols <= max_tile_cols:
    bt_sz = B                       # whole batch in one tile
  else:
    bt_sz = B
    for cand in range(1, B + 1):    # largest divisor giving a 128-aligned tile
      if B % cand == 0 and cand * L <= max_tile_cols and (cand * L) % 128 == 0:
        bt_sz = cand
    # TODO(synk): if no lane-aligned divisor of B exists this falls back to the
    # whole batch in one tile; a padded-lane path would be needed otherwise.
  TILE = bt_sz * L
  nbt = B // bt_sz

  # ---- lane-dense relayout: (B, C, L) -> (C, B*L) ----
  x2 = jnp.transpose(x_ncl.astype(jnp.float32), (1, 0, 2)).reshape(C_in, n_cols)

  col = lambda v: v.reshape(-1, 1).astype(jnp.float32)

  # constant segment matrices (SE pooling / broadcast) and depthwise boundary
  # masks — hoisted out of the kernel entirely.
  seg = jnp.repeat(jnp.eye(bt_sz, dtype=jnp.float32), L, axis=1)   # (Bt, TILE)
  segt = seg.T * (1.0 / L)                                         # (TILE, Bt)
  pos = jnp.arange(TILE, dtype=jnp.int32) % L
  mask_l = (pos != 0).astype(jnp.float32).reshape(1, TILE)
  mask_r = (pos != L - 1).astype(jnp.float32).reshape(1, TILE)

  weights = (
      p["w_exp"].astype(jnp.float32), col(p["g0"]), col(p["b0"]),
      p["w_dw"].astype(jnp.float32), col(p["g1"]), col(p["b1"]),
      p["w_ser"].astype(jnp.float32), col(p["b_ser"]),
      p["w_see"].astype(jnp.float32), col(p["b_see"]),
      p["w_proj"].astype(jnp.float32), col(p["g2"]), col(p["b2"]),
      seg, segt, mask_l, mask_r,
  )

  def wspec(arr):   # small params: whole array resident, never re-fetched
    return pl.BlockSpec(arr.shape, lambda ph, bb: (0, 0))

  # x is only needed in phase 0 (expand) and phase 3 (residual); pin its block
  # index elsewhere so it is not re-fetched during phases 1-2.
  x_spec = pl.BlockSpec(
      (C_in, TILE),
      lambda ph, bb: (0, jnp.where((ph == 0) | (ph == 3), bb, 0)))
  # phase-aware output writeback: the output block only walks the batch tiles
  # in phase 3, so each tile is flushed to HBM exactly once (no garbage writes
  # from phases 0-2).
  out_spec = pl.BlockSpec(
      (C_out, TILE), lambda ph, bb: (0, jnp.where(ph == 3, bb, 0)))

  kernel = functools.partial(
      _mbconv_kernel, L=L, TILE=TILE, n_cols=n_cols, eps=1e-5,
      has_residual=has_residual, matmul_dtype=matmul_dtype)

  # TODO(synk): for activations too large for VMEM (esp. v7x 64 MiB), spill the
  # h0/h1/h2 caches to an HBM scratch (pl.ANY + make_async_copy) instead.
  # TODO(synk): v7x dual-TensorCore: shard the batch-tile axis across cores with
  # per-core partial stats and a cross-core reduction before each BN fold.
  scratch_shapes = [
      pltpu.VMEM((C_exp, 1), jnp.float32),     # sum    (bn0)
      pltpu.VMEM((C_exp, 1), jnp.float32),     # sumsq  (bn0)
      pltpu.VMEM((C_exp, 1), jnp.float32),     # sum    (bn1)
      pltpu.VMEM((C_exp, 1), jnp.float32),     # sumsq  (bn1)
      pltpu.VMEM((C_out, 1), jnp.float32),     # sum    (bn2)
      pltpu.VMEM((C_out, 1), jnp.float32),     # sumsq  (bn2)
      pltpu.VMEM((C_exp, 1), jnp.float32),     # folded scale (bn0)
      pltpu.VMEM((C_exp, 1), jnp.float32),     # folded shift (bn0)
      pltpu.VMEM((C_exp, 1), jnp.float32),     # folded scale (bn1)
      pltpu.VMEM((C_exp, 1), jnp.float32),     # folded shift (bn1)
      pltpu.VMEM((C_out, 1), jnp.float32),     # folded scale (bn2)
      pltpu.VMEM((C_out, 1), jnp.float32),     # folded shift (bn2)
      pltpu.VMEM((nbt, C_exp, TILE), jnp.float32),   # h0 cache (pre-BN0)
      pltpu.VMEM((nbt, C_exp, TILE), jnp.float32),   # h1 cache (pre-BN1)
      pltpu.VMEM((nbt, C_out, TILE), jnp.float32),   # h2 cache (pre-BN2)
  ]

  out2 = pl.pallas_call(
      kernel,
      grid=(4, nbt),                 # (phase, batch tile); phase outermost
      out_shape=jax.ShapeDtypeStruct((C_out, n_cols), jnp.float32),
      in_specs=[x_spec] + [wspec(w) for w in weights],
      out_specs=out_spec,
      scratch_shapes=scratch_shapes,
      # Both axes are sequential: phases must finish in order and the batch-tile
      # axis carries the BN stat accumulation.
      compiler_params=pltpu.CompilerParams(
          dimension_semantics=("arbitrary", "arbitrary")),
  )(x2, *weights)

  return out2.reshape(C_out, B, L).transpose(1, 0, 2)


def mbconv_reference(x, p, *, has_residual):
  """Pure-JAX NCL reference mirroring the PyTorch forward (train-mode BN)."""
  def bn(v, g, b, eps=1e-5):
    mu = v.mean(axis=(0, 2), keepdims=True)
    var = ((v - mu) ** 2).mean(axis=(0, 2), keepdims=True)
    return g[None, :, None] * (v - mu) / jnp.sqrt(var + eps) + b[None, :, None]

  swish = lambda v: v * jax.nn.sigmoid(v)

  h = jnp.einsum("oc,bcl->bol", p["w_exp"], x)
  h = swish(bn(h, p["g0"], p["b0"]))
  hp = jnp.pad(h, ((0, 0), (0, 0), (1, 1)))
  h = (p["w_dw"][None, :, 0:1] * hp[:, :, :-2]
       + p["w_dw"][None, :, 1:2] * hp[:, :, 1:-1]
       + p["w_dw"][None, :, 2:3] * hp[:, :, 2:])
  h = swish(bn(h, p["g1"], p["b1"]))
  se = h.mean(axis=2)                                            # (B, C_exp)
  se = jnp.einsum("rc,bc->br", p["w_ser"], se) + p["b_ser"][None, :]
  se = jax.nn.relu(se)
  se = jnp.einsum("cr,br->bc", p["w_see"], se) + p["b_see"][None, :]
  se = jax.nn.sigmoid(se)
  h = h * se[:, :, None]
  out = jnp.einsum("oc,bcl->bol", p["w_proj"], h)
  out = bn(out, p["g2"], p["b2"])
  if has_residual:
    out = out + x
  return out


def init_params(key, in_channels, out_channels, expand_ratio, se_ratio):
  c_exp = in_channels * expand_ratio
  c_red = max(1, int(c_exp * se_ratio))
  ks = jax.random.split(key, 10)
  n = lambda k, shape, s=0.1: (s * jax.random.normal(k, shape)).astype(jnp.float32)
  return {
      "w_exp": n(ks[0], (c_exp, in_channels)),        # Conv1d (out,in,1) squeezed
      "g0": 1.0 + n(ks[1], (c_exp,)), "b0": n(ks[2], (c_exp,)),
      "w_dw": n(ks[3], (c_exp, 3)),                   # depthwise (C,1,3) squeezed
      "g1": 1.0 + n(ks[4], (c_exp,)), "b1": n(ks[5], (c_exp,)),
      "w_ser": n(ks[6], (c_red, c_exp)), "b_ser": n(ks[6], (c_red,)),
      "w_see": n(ks[7], (c_exp, c_red)), "b_see": n(ks[7], (c_exp,)),
      "w_proj": n(ks[8], (out_channels, c_exp)),
      "g2": 1.0 + n(ks[9], (out_channels,)), "b2": n(ks[9], (out_channels,)),
  }


if __name__ == "__main__":
  # MBConvBlock(in_channels=4, out_channels=4, expand_ratio=4, stride=1, se_ratio=0.25)
  B, C_in, L = 2, 4, 16
  C_out, expand_ratio, stride, se_ratio = 4, 4, 1, 0.25
  has_residual = (stride == 1) and (C_in == C_out)

  key = jax.random.PRNGKey(0)
  kx, kp = jax.random.split(key)
  x = jax.random.normal(kx, (B, C_in, L), dtype=jnp.float32)
  params = init_params(kp, C_in, C_out, expand_ratio, se_ratio)

  ref = mbconv_reference(x, params, has_residual=has_residual)

  # f32 MXU operands: tight check against the f32 reference.
  out_f32 = jax.block_until_ready(
      mbconv_forward(x, params, stride=stride, has_residual=has_residual,
                     matmul_dtype=jnp.float32))
  assert out_f32.shape == (B, C_out, L)
  err32 = float(jnp.max(jnp.abs(out_f32 - ref)))
  assert err32 < 1e-3, f"f32 max abs err {err32}"

  # default bf16 MXU operands (v5e/v6e/v7x MXU peak); BN stats are computed on
  # bf16-matmul outputs so the check against the f32 reference is looser.
  out_bf16 = jax.block_until_ready(
      mbconv_forward(x, params, stride=stride, has_residual=has_residual))
  assert out_bf16.shape == (B, C_out, L)
  errbf = float(jnp.max(jnp.abs(out_bf16 - ref)))
  assert jnp.allclose(out_bf16, ref, atol=1e-1, rtol=1e-1), f"bf16 max abs err {errbf}"

  print("KERNEL_OK")
</pallas_src>

<mosaic_0001>
module attributes {stable_mosaic.version = 11 : i64} {
  func.func @_mbconv_kernel(%arg0: i32, %arg1: i32, %arg2: memref<4x32xf32, #tpu.memory_space<vmem>>, %arg3: memref<16x4xf32, #tpu.memory_space<vmem>>, %arg4: memref<16x1xf32, #tpu.memory_space<vmem>>, %arg5: memref<16x1xf32, #tpu.memory_space<vmem>>, %arg6: memref<16x3xf32, #tpu.memory_space<vmem>>, %arg7: memref<16x1xf32, #tpu.memory_space<vmem>>, %arg8: memref<16x1xf32, #tpu.memory_space<vmem>>, %arg9: memref<4x16xf32, #tpu.memory_space<vmem>>, %arg10: memref<4x1xf32, #tpu.memory_space<vmem>>, %arg11: memref<16x4xf32, #tpu.memory_space<vmem>>, %arg12: memref<16x1xf32, #tpu.memory_space<vmem>>, %arg13: memref<4x16xf32, #tpu.memory_space<vmem>>, %arg14: memref<4x1xf32, #tpu.memory_space<vmem>>, %arg15: memref<4x1xf32, #tpu.memory_space<vmem>>, %arg16: memref<2x32xf32, #tpu.memory_space<vmem>>, %arg17: memref<32x2xf32, #tpu.memory_space<vmem>>, %arg18: memref<1x32xf32, #tpu.memory_space<vmem>>, %arg19: memref<1x32xf32, #tpu.memory_space<vmem>>, %arg20: memref<4x32xf32, #tpu.memory_space<vmem>>, %arg21: memref<16x1xf32, #tpu.memory_space<vmem>>, %arg22: memref<16x1xf32, #tpu.memory_space<vmem>>, %arg23: memref<16x1xf32, #tpu.memory_space<vmem>>, %arg24: memref<16x1xf32, #tpu.memory_space<vmem>>, %arg25: memref<4x1xf32, #tpu.memory_space<vmem>>, %arg26: memref<4x1xf32, #tpu.memory_space<vmem>>, %arg27: memref<16x1xf32, #tpu.memory_space<vmem>>, %arg28: memref<16x1xf32, #tpu.memory_space<vmem>>, %arg29: memref<16x1xf32, #tpu.memory_space<vmem>>, %arg30: memref<16x1xf32, #tpu.memory_space<vmem>>, %arg31: memref<4x1xf32, #tpu.memory_space<vmem>>, %arg32: memref<4x1xf32, #tpu.memory_space<vmem>>, %arg33: memref<1x16x32xf32, #tpu.memory_space<vmem>>, %arg34: memref<1x16x32xf32, #tpu.memory_space<vmem>>, %arg35: memref<1x4x32xf32, #tpu.memory_space<vmem>>) attributes {dimension_semantics = [#tpu.dimension_semantics<arbitrary>, #tpu.dimension_semantics<arbitrary>], iteration_bounds = array<i64: 4, 1>, scalar_prefetch = 0 : i64, scratch_operands = 15 : i64, tpu.core_type = #tpu.core_type<tc>, window_params = [{transform_indices = @transform_0, window_bounds = array<i64: 4, 32>}, {pipeline_mode = #tpu.pipeline_mode<synchronous>, transform_indices = @transform_1, window_bounds = array<i64: 16, 4>}, {pipeline_mode = #tpu.pipeline_mode<synchronous>, transform_indices = @transform_2, window_bounds = array<i64: 16, 1>}, {pipeline_mode = #tpu.pipeline_mode<synchronous>, transform_indices = @transform_3, window_bounds = array<i64: 16, 1>}, {pipeline_mode = #tpu.pipeline_mode<synchronous>, transform_indices = @transform_4, window_bounds = array<i64: 16, 3>}, {pipeline_mode = #tpu.pipeline_mode<synchronous>, transform_indices = @transform_5, window_bounds = array<i64: 16, 1>}, {pipeline_mode = #tpu.pipeline_mode<synchronous>, transform_indices = @transform_6, window_bounds = array<i64: 16, 1>}, {pipeline_mode = #tpu.pipeline_mode<synchronous>, transform_indices = @transform_7, window_bounds = array<i64: 4, 16>}, {pipeline_mode = #tpu.pipeline_mode<synchronous>, transform_indices = @transform_8, window_bounds = array<i64: 4, 1>}, {pipeline_mode = #tpu.pipeline_mode<synchronous>, transform_indices = @transform_9, window_bounds = array<i64: 16, 4>}, {pipeline_mode = #tpu.pipeline_mode<synchronous>, transform_indices = @transform_10, window_bounds = array<i64: 16, 1>}, {pipeline_mode = #tpu.pipeline_mode<synchronous>, transform_indices = @transform_11, window_bounds = array<i64: 4, 16>}, {pipeline_mode = #tpu.pipeline_mode<synchronous>, transform_indices = @transform_12, window_bounds = array<i64: 4, 1>}, {pipeline_mode = #tpu.pipeline_mode<synchronous>, transform_indices = @transform_13, window_bounds = array<i64: 4, 1>}, {pipeline_mode = #tpu.pipeline_mode<synchronous>, transform_indices = @transform_14, window_bounds = array<i64: 2, 32>}, {pipeline_mode = #tpu.pipeline_mode<synchronous>, transform_indices = @transform_15, window_bounds = array<i64: 32, 2>}, {pipeline_mode = #tpu.pipeline_mode<synchronous>, transform_indices = @transform_16, window_bounds = array<i64: 1, 32>}, {pipeline_mode = #tpu.pipeline_mode<synchronous>, transform_indices = @transform_17, window_bounds = array<i64: 1, 32>}, {transform_indices = @transform_18, window_bounds = array<i64: 4, 32>}]} {
    %c0_i32 = arith.constant 0 : i32
    %0 = arith.cmpi eq, %arg0, %c0_i32 : i32
    %c0_i32_0 = arith.constant 0 : i32
    %1 = arith.cmpi eq, %arg1, %c0_i32_0 : i32
    %2 = arith.andi %0, %1 : i1
    %3 = arith.extui %2 : i1 to i32
    %c0_i32_1 = arith.constant 0 : i32
    %4 = arith.cmpi ne, %3, %c0_i32_1 : i32
    scf.if %4 {
      %cst = arith.constant 0.000000e+00 : f32
      %32 = vector.broadcast %cst : f32 to vector<16x1xf32>
      %c0 = arith.constant 0 : index
      %c0_16 = arith.constant 0 : index
      %33 = vector.load %arg21[%c0, %c0_16] : memref<16x1xf32, #tpu.memory_space<vmem>>, vector<16x1xf32>
      tpu.vector_store %arg21[%c0, %c0_16], %32 {strides = array<i32>} : memref<16x1xf32, #tpu.memory_space<vmem>>, vector<16x1xf32>,
      %cst_17 = arith.constant 0.000000e+00 : f32
      %34 = vector.broadcast %cst_17 : f32 to vector<16x1xf32>
      %c0_18 = arith.constant 0 : index
      %c0_19 = arith.constant 0 : index
      %35 = vector.load %arg22[%c0_18, %c0_19] : memref<16x1xf32, #tpu.memory_space<vmem>>, vector<16x1xf32>
      tpu.vector_store %arg22[%c0_18, %c0_19], %34 {strides = array<i32>} : memref<16x1xf32, #tpu.memory_space<vmem>>, vector<16x1xf32>,
      %cst_20 = arith.constant 0.000000e+00 : f32
      %36 = vector.broadcast %cst_20 : f32 to vector<16x1xf32>
      %c0_21 = arith.constant 0 : index
      %c0_22 = arith.constant 0 : index
      %37 = vector.load %arg23[%c0_21, %c0_22] : memref<16x1xf32, #tpu.memory_space<vmem>>, vector<16x1xf32>
      tpu.vector_store %arg23[%c0_21, %c0_22], %36 {strides = array<i32>} : memref<16x1xf32, #tpu.memory_space<vmem>>, vector<16x1xf32>,
      %cst_23 = arith.constant 0.000000e+00 : f32
      %38 = vector.broadcast %cst_23 : f32 to vector<16x1xf32>
      %c0_24 = arith.constant 0 : index
      %c0_25 = arith.constant 0 : index
      %39 = vector.load %arg24[%c0_24, %c0_25] : memref<16x1xf32, #tpu.memory_space<vmem>>, vector<16x1xf32>
      tpu.vector_store %arg24[%c0_24, %c0_25], %38 {strides = array<i32>} : memref<16x1xf32, #tpu.memory_space<vmem>>, vector<16x1xf32>,
      %cst_26 = arith.constant 0.000000e+00 : f32
      %40 = vector.broadcast %cst_26 : f32 to vector<4x1xf32>
      %c0_27 = arith.constant 0 : index
      %c0_28 = arith.constant 0 : index
      %41 = vector.load %arg25[%c0_27, %c0_28] : memref<4x1xf32, #tpu.memory_space<vmem>>, vector<4x1xf32>
      tpu.vector_store %arg25[%c0_27, %c0_28], %40 {strides = array<i32>} : memref<4x1xf32, #tpu.memory_space<vmem>>, vector<4x1xf32>,
      %cst_29 = arith.constant 0.000000e+00 : f32
      %42 = vector.broadcast %cst_29 : f32 to vector<4x1xf32>
      %c0_30 = arith.constant 0 : index
      %c0_31 = arith.constant 0 : index
      %43 = vector.load %arg26[%c0_30, %c0_31] : memref<4x1xf32, #tpu.memory_space<vmem>>, vector<4x1xf32>
      tpu.vector_store %arg26[%c0_30, %c0_31], %42 {strides = array<i32>} : memref<4x1xf32, #tpu.memory_space<vmem>>, vector<4x1xf32>,
    } else {
    }
    %c0_i32_2 = arith.constant 0 : i32
    %5 = arith.cmpi eq, %arg0, %c0_i32_2 : i32
    %6 = arith.extui %5 : i1 to i32
    %c0_i32_3 = arith.constant 0 : i32
    %7 = arith.cmpi ne, %6, %c0_i32_3 : i32
    scf.if %7 {
      %c0 = arith.constant 0 : index
      %c0_16 = arith.constant 0 : index
      %32 = vector.load %arg3[%c0, %c0_16] : memref<16x4xf32, #tpu.memory_space<vmem>>, vector<16x4xf32>
      %c0_17 = arith.constant 0 : index
      %c0_18 = arith.constant 0 : index
      %33 = vector.load %arg2[%c0_17, %c0_18] : memref<4x32xf32, #tpu.memory_space<vmem>>, vector<4x32xf32>
      %cst = arith.constant dense<0.000000e+00> : vector<16x32xf32>
      %34 = tpu.matmul %32, %33, %cst {dimension_numbers = #tpu.dot_dimension_numbers<[1], [0], [0], [1], [0, 0, 1, 1], [], []>} : vector<16x4xf32>, vector<4x32xf32>, vector<16x32xf32> -> vector<16x32xf32>
      %35 = arith.index_cast %arg1 : i32 to index
      %c0_19 = arith.constant 0 : index
      %c0_20 = arith.constant 0 : index
      %36 = vector.load %arg33[%35, %c0_19, %c0_20] : memref<1x16x32xf32, #tpu.memory_space<vmem>>, vector<1x16x32xf32>
      %37 = vector.shape_cast %36 : vector<1x16x32xf32> to vector<16x32xf32>
      %38 = vector.shape_cast %34 : vector<16x32xf32> to vector<1x16x32xf32>
      tpu.vector_store %arg33[%35, %c0_19, %c0_20], %38 {strides = array<i32>} : memref<1x16x32xf32, #tpu.memory_space<vmem>>, vector<1x16x32xf32>,
      %c0_21 = arith.constant 0 : index
      %c0_22 = arith.constant 0 : index
      %39 = vector.load %arg21[%c0_21, %c0_22] : memref<16x1xf32, #tpu.memory_space<vmem>>, vector<16x1xf32>
      %cst_23 = arith.constant dense<0.000000e+00> : vector<16xf32>
      %40 = vector.multi_reduction <add>, %34, %cst_23 [1] : vector<16x32xf32> to vector<16xf32>
      %41 = vector.shape_cast %40 : vector<16xf32> to vector<16x1xf32>
      %42 = arith.addf %39, %41 : vector<16x1xf32>
      %c0_24 = arith.constant 0 : index
      %c0_25 = arith.constant 0 : index
      %43 = vector.load %arg21[%c0_24, %c0_25] : memref<16x1xf32, #tpu.memory_space<vmem>>, vector<16x1xf32>
      tpu.vector_store %arg21[%c0_24, %c0_25], %42 {strides = array<i32>} : memref<16x1xf32, #tpu.memory_space<vmem>>, vector<16x1xf32>,
      %c0_26 = arith.constant 0 : index
      %c0_27 = arith.constant 0 : index
      %44 = vector.load %arg22[%c0_26, %c0_27] : memref<16x1xf32, #tpu.memory_space<vmem>>, vector<16x1xf32>
      %45 = arith.mulf %34, %34 : vector<16x32xf32>
      %cst_28 = arith.constant dense<0.000000e+00> : vector<16xf32>
      %46 = vector.multi_reduction <add>, %45, %cst_28 [1] : vector<16x32xf32> to vector<16xf32>
      %47 = vector.shape_cast %46 : vector<16xf32> to vector<16x1xf32>
      %48 = arith.addf %44, %47 : vector<16x1xf32>
      %c0_29 = arith.constant 0 : index
      %c0_30 = arith.constant 0 : index
      %49 = vector.load %arg22[%c0_29, %c0_30] : memref<16x1xf32, #tpu.memory_space<vmem>>, vector<16x1xf32>
      tpu.vector_store %arg22[%c0_29, %c0_30], %48 {strides = array<i32>} : memref<16x1xf32, #tpu.memory_space<vmem>>, vector<16x1xf32>,
    } else {
    }
    %c1_i32 = arith.constant 1 : i32
    %8 = arith.cmpi eq, %arg0, %c1_i32 : i32
    %c0_i32_4 = arith.constant 0 : i32
    %9 = arith.cmpi eq, %arg1, %c0_i32_4 : i32
    %10 = arith.andi %8, %9 : i1
    %11 = arith.extui %10 : i1 to i32
    %c0_i32_5 = arith.constant 0 : i32
    %12 = arith.cmpi ne, %11, %c0_i32_5 : i32
    scf.if %12 {
      %c0 = arith.constant 0 : index
      %c0_16 = arith.constant 0 : index
      %32 = vector.load %arg21[%c0, %c0_16] : memref<16x1xf32, #tpu.memory_space<vmem>>, vector<16x1xf32>
      %cst = arith.constant 3.125000e-02 : f32
      %33 = vector.broadcast %cst : f32 to vector<16x1xf32>
      %34 = arith.mulf %32, %33 : vector<16x1xf32>
      %c0_17 = arith.constant 0 : index
      %c0_18 = arith.constant 0 : index
      %35 = vector.load %arg22[%c0_17, %c0_18] : memref<16x1xf32, #tpu.memory_space<vmem>>, vector<16x1xf32>
      %cst_19 = arith.constant 3.125000e-02 : f32
      %36 = vector.broadcast %cst_19 : f32 to vector<16x1xf32>
      %37 = arith.mulf %35, %36 : vector<16x1xf32>
      %38 = arith.mulf %34, %34 : vector<16x1xf32>
      %39 = arith.subf %37, %38 : vector<16x1xf32>
      %cst_20 = arith.constant 0.000000e+00 : f32
      %40 = vector.broadcast %cst_20 : f32 to vector<16x1xf32>
      %41 = arith.maximumf %39, %40 : vector<16x1xf32>
      %c0_21 = arith.constant 0 : index
      %c0_22 = arith.constant 0 : index
      %42 = vector.load %arg4[%c0_21, %c0_22] : memref<16x1xf32, #tpu.memory_space<vmem>>, vector<16x1xf32>
      %cst_23 = arith.constant 9.99999974E-6 : f32
      %43 = vector.broadcast %cst_23 : f32 to vector<16x1xf32>
      %44 = arith.addf %41, %43 : vector<16x1xf32>
      %45 = math.rsqrt %44 : vector<16x1xf32>
      %46 = arith.mulf %42, %45 : vector<16x1xf32>
      %c0_24 = arith.constant 0 : index
      %c0_25 = arith.constant 0 : index
      %47 = vector.load %arg27[%c0_24, %c0_25] : memref<16x1xf32, #tpu.memory_space<vmem>>, vector<16x1xf32>
      tpu.vector_store %arg27[%c0_24, %c0_25], %46 {strides = array<i32>} : memref<16x1xf32, #tpu.memory_space<vmem>>, vector<16x1xf32>,
      %c0_26 = arith.constant 0 : index
      %c0_27 = arith.constant 0 : index
      %48 = vector.load %arg5[%c0_26, %c0_27] : memref<16x1xf32, #tpu.memory_space<vmem>>, vector<16x1xf32>
      %49 = arith.mulf %46, %34 : vector<16x1xf32>
      %50 = arith.subf %48, %49 : vector<16x1xf32>
      %c0_28 = arith.constant 0 : index
      %c0_29 = arith.constant 0 : index
      %51 = vector.load %arg28[%c0_28, %c0_29] : memref<16x1xf32, #tpu.memory_space<vmem>>, vector<16x1xf32>
      tpu.vector_store %arg28[%c0_28, %c0_29], %50 {strides = array<i32>} : memref<16x1xf32, #tpu.memory_space<vmem>>, vector<16x1xf32>,
    } else {
    }
    %c1_i32_6 = arith.constant 1 : i32
    %13 = arith.cmpi eq, %arg0, %c1_i32_6 : i32
    %14 = arith.extui %13 : i1 to i32
    %c0_i32_7 = arith.constant 0 : i32
    %15 = arith.cmpi ne, %14, %c0_i32_7 : i32
    scf.if %15 {
      %32 = arith.index_cast %arg1 : i32 to index
      %c0 = arith.constant 0 : index
      %c0_16 = arith.constant 0 : index
      %33 = vector.load %arg33[%32, %c0, %c0_16] : memref<1x16x32xf32, #tpu.memory_space<vmem>>, vector<1x16x32xf32>
      %34 = vector.shape_cast %33 : vector<1x16x32xf32> to vector<16x32xf32>
      %c0_17 = arith.constant 0 : index
      %c0_18 = arith.constant 0 : index
      %35 = vector.load %arg27[%c0_17, %c0_18] : memref<16x1xf32, #tpu.memory_space<vmem>>, vector<16x1xf32>
      %36 = vector.broadcast %35 : vector<16x1xf32> to vector<16x32xf32>
      %37 = arith.mulf %34, %36 : vector<16x32xf32>
      %c0_19 = arith.constant 0 : index
      %c0_20 = arith.constant 0 : index
      %38 = vector.load %arg28[%c0_19, %c0_20] : memref<16x1xf32, #tpu.memory_space<vmem>>, vector<16x1xf32>
      %39 = vector.broadcast %38 : vector<16x1xf32> to vector<16x32xf32>
      %40 = arith.addf %37, %39 : vector<16x32xf32>
      %cst = arith.constant 5.000000e-01 : f32
      %41 = vector.broadcast %cst : f32 to vector<16x32xf32>
      %42 = arith.mulf %41, %40 : vector<16x32xf32>
      %43 = math.tanh %42 : vector<16x32xf32>
      %cst_21 = arith.constant 1.000000e+00 : f32
      %44 = vector.broadcast %cst_21 : f32 to vector<16x32xf32>
      %45 = arith.addf %43, %44 : vector<16x32xf32>
      %cst_22 = arith.constant 5.000000e-01 : f32
      %46 = vector.broadcast %cst_22 : f32 to vector<16x32xf32>
      %47 = arith.mulf %46, %45 : vector<16x32xf32>
      %48 = arith.mulf %40, %47 : vector<16x32xf32>
      %49 = vector.extract_strided_slice %48 {offsets = [0, 0], sizes = [16, 1], strides = [1, 1]} : vector<16x32xf32> to vector<16x1xf32>
      %50 = vector.extract_strided_slice %48 {offsets = [0, 0], sizes = [16, 31], strides = [1, 1]} : vector<16x32xf32> to vector<16x31xf32>
      %51 = tpu.concatenate %49, %50 in 1 : vector<16x1xf32>, vector<16x31xf32> -> vector<16x32xf32>
      %52 = vector.extract_strided_slice %48 {offsets = [0, 1], sizes = [16, 31], strides = [1, 1]} : vector<16x32xf32> to vector<16x31xf32>
      %53 = vector.extract_strided_slice %48 {offsets = [0, 31], sizes = [16, 1], strides = [1, 1]} : vector<16x32xf32> to vector<16x1xf32>
      %54 = tpu.concatenate %52, %53 in 1 : vector<16x31xf32>, vector<16x1xf32> -> vector<16x32xf32>
      %c0_23 = arith.constant 0 : index
      %c0_24 = arith.constant 0 : index
      %55 = vector.load %arg6[%c0_23, %c0_24] : memref<16x3xf32, #tpu.memory_space<vmem>>, vector<16x3xf32>
      %56 = vector.extract_strided_slice %55 {offsets = [0, 0], sizes = [16, 1], strides = [1, 1]} : vector<16x3xf32> to vector<16x1xf32>
      %c0_25 = arith.constant 0 : index
      %c0_26 = arith.constant 0 : index
      %57 = vector.load %arg18[%c0_25, %c0_26] : memref<1x32xf32, #tpu.memory_space<vmem>>, vector<1x32xf32>
      %58 = vector.broadcast %57 : vector<1x32xf32> to vector<16x32xf32>
      %59 = arith.mulf %51, %58 : vector<16x32xf32>
      %60 = vector.broadcast %56 : vector<16x1xf32> to vector<16x32xf32>
      %61 = arith.mulf %60, %59 : vector<16x32xf32>
      %62 = vector.extract_strided_slice %55 {offsets = [0, 1], sizes = [16, 1], strides = [1, 1]} : vector<16x3xf32> to vector<16x1xf32>
      %63 = vector.broadcast %62 : vector<16x1xf32> to vector<16x32xf32>
      %64 = arith.mulf %63, %48 : vector<16x32xf32>
      %65 = arith.addf %61, %64 : vector<16x32xf32>
      %66 = vector.extract_strided_slice %55 {offsets = [0, 2], sizes = [16, 1], strides = [1, 1]} : vector<16x3xf32> to vector<16x1xf32>
      %c0_27 = arith.constant 0 : index
      %c0_28 = arith.constant 0 : index
      %67 = vector.load %arg19[%c0_27, %c0_28] : memref<1x32xf32, #tpu.memory_space<vmem>>, vector<1x32xf32>
      %68 = vector.broadcast %67 : vector<1x32xf32> to vector<16x32xf32>
      %69 = arith.mulf %54, %68 : vector<16x32xf32>
      %70 = vector.broadcast %66 : vector<16x1xf32> to vector<16x32xf32>
      %71 = arith.mulf %70, %69 : vector<16x32xf32>
      %72 = arith.addf %65, %71 : vector<16x32xf32>
      %73 = arith.index_cast %arg1 : i32 to index
      %c0_29 = arith.constant 0 : index
      %c0_30 = arith.constant 0 : index
      %74 = vector.load %arg34[%73, %c0_29, %c0_30] : memref<1x16x32xf32, #tpu.memory_space<vmem>>, vector<1x16x32xf32>
      %75 = vector.shape_cast %74 : vector<1x16x32xf32> to vector<16x32xf32>
      %76 = vector.shape_cast %72 : vector<16x32xf32> to vector<1x16x32xf32>
      tpu.vector_store %arg34[%73, %c0_29, %c0_30], %76 {strides = array<i32>} : memref<1x16x32xf32, #tpu.memory_space<vmem>>, vector<1x16x32xf32>,
      %c0_31 = arith.constant 0 : index
      %c0_32 = arith.constant 0 : index
      %77 = vector.load %arg23[%c0_31, %c0_32] : memref<16x1xf32, #tpu.memory_space<vmem>>, vector<16x1xf32>
      %cst_33 = arith.constant dense<0.000000e+00> : vector<16xf32>
      %78 = vector.multi_reduction <add>, %72, %cst_33 [1] : vector<16x32xf32> to vector<16xf32>
      %79 = vector.shape_cast %78 : vector<16xf32> to vector<16x1xf32>
      %80 = arith.addf %77, %79 : vector<16x1xf32>
      %c0_34 = arith.constant 0 : index
      %c0_35 = arith.constant 0 : index
      %81 = vector.load %arg23[%c0_34, %c0_35] : memref<16x1xf32, #tpu.memory_space<vmem>>, vector<16x1xf32>
      tpu.vector_store %arg23[%c0_34, %c0_35], %80 {strides = array<i32>} : memref<16x1xf32, #tpu.memory_space<vmem>>, vector<16x1xf32>,
      %c0_36 = arith.constant 0 : index
      %c0_37 = arith.constant 0 : index
      %82 = vector.load %arg24[%c0_36, %c0_37] : memref<16x1xf32, #tpu.memory_space<vmem>>, vector<16x1xf32>
      %83 = arith.mulf %72, %72 : vector<16x32xf32>
      %cst_38 = arith.constant dense<0.000000e+00> : vector<16xf32>
      %84 = vector.multi_reduction <add>, %83, %cst_38 [1] : vector<16x32xf32> to vector<16xf32>
      %85 = vector.shape_cast %84 : vector<16xf32> to vector<16x1xf32>
      %86 = arith.addf %82, %85 : vector<16x1xf32>
      %c0_39 = arith.constant 0 : index
      %c0_40 = arith.constant 0 : index
      %87 = vector.load %arg24[%c0_39, %c0_40] : memref<16x1xf32, #tpu.memory_space<vmem>>, vector<16x1xf32>
      tpu.vector_store %arg24[%c0_39, %c0_40], %86 {strides = array<i32>} : memref<16x1xf32, #tpu.memory_space<vmem>>, vector<16x1xf32>,
    } else {
    }
    %c2_i32 = arith.constant 2 : i32
    %16 = arith.cmpi eq, %arg0, %c2_i32 : i32
    %c0_i32_8 = arith.constant 0 : i32
    %17 = arith.cmpi eq, %arg1, %c0_i32_8 : i32
    %18 = arith.andi %16, %17 : i1
    %19 = arith.extui %18 : i1 to i32
    %c0_i32_9 = arith.constant 0 : i32
    %20 = arith.cmpi ne, %19, %c0_i32_9 : i32
    scf.if %20 {
      %c0 = arith.constant 0 : index
      %c0_16 = arith.constant 0 : index
      %32 = vector.load %arg23[%c0, %c0_16] : memref<16x1xf32, #tpu.memory_space<vmem>>, vector<16x1xf32>
      %cst = arith.constant 3.125000e-02 : f32
      %33 = vector.broadcast %cst : f32 to vector<16x1xf32>
      %34 = arith.mulf %32, %33 : vector<16x1xf32>
      %c0_17 = arith.constant 0 : index
      %c0_18 = arith.constant 0 : index
      %35 = vector.load %arg24[%c0_17, %c0_18] : memref<16x1xf32, #tpu.memory_space<vmem>>, vector<16x1xf32>
      %cst_19 = arith.constant 3.125000e-02 : f32
      %36 = vector.broadcast %cst_19 : f32 to vector<16x1xf32>
      %37 = arith.mulf %35, %36 : vector<16x1xf32>
      %38 = arith.mulf %34, %34 : vector<16x1xf32>
      %39 = arith.subf %37, %38 : vector<16x1xf32>
      %cst_20 = arith.constant 0.000000e+00 : f32
      %40 = vector.broadcast %cst_20 : f32 to vector<16x1xf32>
      %41 = arith.maximumf %39, %40 : vector<16x1xf32>
      %c0_21 = arith.constant 0 : index
      %c0_22 = arith.constant 0 : index
      %42 = vector.load %arg7[%c0_21, %c0_22] : memref<16x1xf32, #tpu.memory_space<vmem>>, vector<16x1xf32>
      %cst_23 = arith.constant 9.99999974E-6 : f32
      %43 = vector.broadcast %cst_23 : f32 to vector<16x1xf32>
      %44 = arith.addf %41, %43 : vector<16x1xf32>
      %45 = math.rsqrt %44 : vector<16x1xf32>
      %46 = arith.mulf %42, %45 : vector<16x1xf32>
      %c0_24 = arith.constant 0 : index
      %c0_25 = arith.constant 0 : index
      %47 = vector.load %arg29[%c0_24, %c0_25] : memref<16x1xf32, #tpu.memory_space<vmem>>, vector<16x1xf32>
      tpu.vector_store %arg29[%c0_24, %c0_25], %46 {strides = array<i32>} : memref<16x1xf32, #tpu.memory_space<vmem>>, vector<16x1xf32>,
      %c0_26 = arith.constant 0 : index
      %c0_27 = arith.constant 0 : index
      %48 = vector.load %arg8[%c0_26, %c0_27] : memref<16x1xf32, #tpu.memory_space<vmem>>, vector<16x1xf32>
      %49 = arith.mulf %46, %34 : vector<16x1xf32>
      %50 = arith.subf %48, %49 : vector<16x1xf32>
      %c0_28 = arith.constant 0 : index
      %c0_29 = arith.constant 0 : index
      %51 = vector.load %arg30[%c0_28, %c0_29] : memref<16x1xf32, #tpu.memory_space<vmem>>, vector<16x1xf32>
      tpu.vector_store %arg30[%c0_28, %c0_29], %50 {strides = array<i32>} : memref<16x1xf32, #tpu.memory_space<vmem>>, vector<16x1xf32>,
    } else {
    }
    %c2_i32_10 = arith.constant 2 : i32
    %21 = arith.cmpi eq, %arg0, %c2_i32_10 : i32
    %22 = arith.extui %21 : i1 to i32
    %c0_i32_11 = arith.constant 0 : i32
    %23 = arith.cmpi ne, %22, %c0_i32_11 : i32
    scf.if %23 {
      %32 = arith.index_cast %arg1 : i32 to index
      %c0 = arith.constant 0 : index
      %c0_16 = arith.constant 0 : index
      %33 = vector.load %arg34[%32, %c0, %c0_16] : memref<1x16x32xf32, #tpu.memory_space<vmem>>, vector<1x16x32xf32>
      %34 = vector.shape_cast %33 : vector<1x16x32xf32> to vector<16x32xf32>
      %c0_17 = arith.constant 0 : index
      %c0_18 = arith.constant 0 : index
      %35 = vector.load %arg29[%c0_17, %c0_18] : memref<16x1xf32, #tpu.memory_space<vmem>>, vector<16x1xf32>
      %36 = vector.broadcast %35 : vector<16x1xf32> to vector<16x32xf32>
      %37 = arith.mulf %34, %36 : vector<16x32xf32>
      %c0_19 = arith.constant 0 : index
      %c0_20 = arith.constant 0 : index
      %38 = vector.load %arg30[%c0_19, %c0_20] : memref<16x1xf32, #tpu.memory_space<vmem>>, vector<16x1xf32>
      %39 = vector.broadcast %38 : vector<16x1xf32> to vector<16x32xf32>
      %40 = arith.addf %37, %39 : vector<16x32xf32>
      %cst = arith.constant 5.000000e-01 : f32
      %41 = vector.broadcast %cst : f32 to vector<16x32xf32>
      %42 = arith.mulf %41, %40 : vector<16x32xf32>
      %43 = math.tanh %42 : vector<16x32xf32>
      %cst_21 = arith.constant 1.000000e+00 : f32
      %44 = vector.broadcast %cst_21 : f32 to vector<16x32xf32>
      %45 = arith.addf %43, %44 : vector<16x32xf32>
      %cst_22 = arith.constant 5.000000e-01 : f32
      %46 = vector.broadcast %cst_22 : f32 to vector<16x32xf32>
      %47 = arith.mulf %46, %45 : vector<16x32xf32>
      %48 = arith.mulf %40, %47 : vector<16x32xf32>
      %c0_23 = arith.constant 0 : index
      %c0_24 = arith.constant 0 : index
      %49 = vector.load %arg17[%c0_23, %c0_24] : memref<32x2xf32, #tpu.memory_space<vmem>>, vector<32x2xf32>
      %cst_25 = arith.constant dense<0.000000e+00> : vector<16x2xf32>
      %50 = tpu.matmul %48, %49, %cst_25 {dimension_numbers = #tpu.dot_dimension_numbers<[1], [0], [0], [1], [0, 0, 1, 1], [], []>} : vector<16x32xf32>, vector<32x2xf32>, vector<16x2xf32> -> vector<16x2xf32>
      %c0_26 = arith.constant 0 : index
      %c0_27 = arith.constant 0 : index
      %51 = vector.load %arg9[%c0_26, %c0_27] : memref<4x16xf32, #tpu.memory_space<vmem>>, vector<4x16xf32>
      %cst_28 = arith.constant dense<0.000000e+00> : vector<4x2xf32>
      %52 = tpu.matmul %51, %50, %cst_28 {dimension_numbers = #tpu.dot_dimension_numbers<[1], [0], [0], [1], [0, 0, 1, 1], [], []>} : vector<4x16xf32>, vector<16x2xf32>, vector<4x2xf32> -> vector<4x2xf32>
      %c0_29 = arith.constant 0 : index
      %c0_30 = arith.constant 0 : index
      %53 = vector.load %arg10[%c0_29, %c0_30] : memref<4x1xf32, #tpu.memory_space<vmem>>, vector<4x1xf32>
      %54 = vector.broadcast %53 : vector<4x1xf32> to vector<4x2xf32>
      %55 = arith.addf %52, %54 : vector<4x2xf32>
      %cst_31 = arith.constant 0.000000e+00 : f32
      %56 = vector.broadcast %cst_31 : f32 to vector<4x2xf32>
      %57 = arith.maximumf %55, %56 : vector<4x2xf32>
      %c0_32 = arith.constant 0 : index
      %c0_33 = arith.constant 0 : index
      %58 = vector.load %arg11[%c0_32, %c0_33] : memref<16x4xf32, #tpu.memory_space<vmem>>, vector<16x4xf32>
      %cst_34 = arith.constant dense<0.000000e+00> : vector<16x2xf32>
      %59 = tpu.matmul %58, %57, %cst_34 {dimension_numbers = #tpu.dot_dimension_numbers<[1], [0], [0], [1], [0, 0, 1, 1], [], []>} : vector<16x4xf32>, vector<4x2xf32>, vector<16x2xf32> -> vector<16x2xf32>
      %c0_35 = arith.constant 0 : index
      %c0_36 = arith.constant 0 : index
      %60 = vector.load %arg12[%c0_35, %c0_36] : memref<16x1xf32, #tpu.memory_space<vmem>>, vector<16x1xf32>
      %61 = vector.broadcast %60 : vector<16x1xf32> to vector<16x2xf32>
      %62 = arith.addf %59, %61 : vector<16x2xf32>
      %cst_37 = arith.constant 5.000000e-01 : f32
      %63 = vector.broadcast %cst_37 : f32 to vector<16x2xf32>
      %64 = arith.mulf %63, %62 : vector<16x2xf32>
      %65 = math.tanh %64 : vector<16x2xf32>
      %cst_38 = arith.constant 1.000000e+00 : f32
      %66 = vector.broadcast %cst_38 : f32 to vector<16x2xf32>
      %67 = arith.addf %65, %66 : vector<16x2xf32>
      %cst_39 = arith.constant 5.000000e-01 : f32
      %68 = vector.broadcast %cst_39 : f32 to vector<16x2xf32>
      %69 = arith.mulf %68, %67 : vector<16x2xf32>
      %c0_40 = arith.constant 0 : index
      %c0_41 = arith.constant 0 : index
      %70 = vector.load %arg16[%c0_40, %c0_41] : memref<2x32xf32, #tpu.memory_space<vmem>>, vector<2x32xf32>
      %cst_42 = arith.constant dense<0.000000e+00> : vector<16x32xf32>
      %71 = tpu.matmul %69, %70, %cst_42 {dimension_numbers = #tpu.dot_dimension_numbers<[1], [0], [0], [1], [0, 0, 1, 1], [], []>} : vector<16x2xf32>, vector<2x32xf32>, vector<16x32xf32> -> vector<16x32xf32>
      %72 = arith.mulf %48, %71 : vector<16x32xf32>
      %c0_43 = arith.constant 0 : index
      %c0_44 = arith.constant 0 : index
      %73 = vector.load %arg13[%c0_43, %c0_44] : memref<4x16xf32, #tpu.memory_space<vmem>>, vector<4x16xf32>
      %cst_45 = arith.constant dense<0.000000e+00> : vector<4x32xf32>
      %74 = tpu.matmul %73, %72, %cst_45 {dimension_numbers = #tpu.dot_dimension_numbers<[1], [0], [0], [1], [0, 0, 1, 1], [], []>} : vector<4x16xf32>, vector<16x32xf32>, vector<4x32xf32> -> vector<4x32xf32>
      %75 = arith.index_cast %arg1 : i32 to index
      %c0_46 = arith.constant 0 : index
      %c0_47 = arith.constant 0 : index
      %76 = vector.load %arg35[%75, %c0_46, %c0_47] : memref<1x4x32xf32, #tpu.memory_space<vmem>>, vector<1x4x32xf32>
      %77 = vector.shape_cast %76 : vector<1x4x32xf32> to vector<4x32xf32>
      %78 = vector.shape_cast %74 : vector<4x32xf32> to vector<1x4x32xf32>
      tpu.vector_store %arg35[%75, %c0_46, %c0_47], %78 {strides = array<i32>} : memref<1x4x32xf32, #tpu.memory_space<vmem>>, vector<1x4x32xf32>,
      %c0_48 = arith.constant 0 : index
      %c0_49 = arith.constant 0 : index
      %79 = vector.load %arg25[%c0_48, %c0_49] : memref<4x1xf32, #tpu.memory_space<vmem>>, vector<4x1xf32>
      %cst_50 = arith.constant dense<0.000000e+00> : vector<4xf32>
      %80 = vector.multi_reduction <add>, %74, %cst_50 [1] : vector<4x32xf32> to vector<4xf32>
      %81 = vector.shape_cast %80 : vector<4xf32> to vector<4x1xf32>
      %82 = arith.addf %79, %81 : vector<4x1xf32>
      %c0_51 = arith.constant 0 : index
      %c0_52 = arith.constant 0 : index
      %83 = vector.load %arg25[%c0_51, %c0_52] : memref<4x1xf32, #tpu.memory_space<vmem>>, vector<4x1xf32>
      tpu.vector_store %arg25[%c0_51, %c0_52], %82 {strides = array<i32>} : memref<4x1xf32, #tpu.memory_space<vmem>>, vector<4x1xf32>,
      %c0_53 = arith.constant 0 : index
      %c0_54 = arith.constant 0 : index
      %84 = vector.load %arg26[%c0_53, %c0_54] : memref<4x1xf32, #tpu.memory_space<vmem>>, vector<4x1xf32>
      %85 = arith.mulf %74, %74 : vector<4x32xf32>
      %cst_55 = arith.constant dense<0.000000e+00> : vector<4xf32>
      %86 = vector.multi_reduction <add>, %85, %cst_55 [1] : vector<4x32xf32> to vector<4xf32>
      %87 = vector.shape_cast %86 : vector<4xf32> to vector<4x1xf32>
      %88 = arith.addf %84, %87 : vector<4x1xf32>
      %c0_56 = arith.constant 0 : index
      %c0_57 = arith.constant 0 : index
      %89 = vector.load %arg26[%c0_56, %c0_57] : memref<4x1xf32, #tpu.memory_space<vmem>>, vector<4x1xf32>
      tpu.vector_store %arg26[%c0_56, %c0_57], %88 {strides = array<i32>} : memref<4x1xf32, #tpu.memory_space<vmem>>, vector<4x1xf32>,
    } else {
    }
    %c3_i32 = arith.constant 3 : i32
    %24 = arith.cmpi eq, %arg0, %c3_i32 : i32
    %c0_i32_12 = arith.constant 0 : i32
    %25 = arith.cmpi eq, %arg1, %c0_i32_12 : i32
    %26 = arith.andi %24, %25 : i1
    %27 = arith.extui %26 : i1 to i32
    %c0_i32_13 = arith.constant 0 : i32
    %28 = arith.cmpi ne, %27, %c0_i32_13 : i32
    scf.if %28 {
      %c0 = arith.constant 0 : index
      %c0_16 = arith.constant 0 : index
      %32 = vector.load %arg25[%c0, %c0_16] : memref<4x1xf32, #tpu.memory_space<vmem>>, vector<4x1xf32>
      %cst = arith.constant 3.125000e-02 : f32
      %33 = vector.broadcast %cst : f32 to vector<4x1xf32>
      %34 = arith.mulf %32, %33 : vector<4x1xf32>
      %c0_17 = arith.constant 0 : index
      %c0_18 = arith.constant 0 : index
      %35 = vector.load %arg26[%c0_17, %c0_18] : memref<4x1xf32, #tpu.memory_space<vmem>>, vector<4x1xf32>
      %cst_19 = arith.constant 3.125000e-02 : f32
      %36 = vector.broadcast %cst_19 : f32 to vector<4x1xf32>
      %37 = arith.mulf %35, %36 : vector<4x1xf32>
      %38 = arith.mulf %34, %34 : vector<4x1xf32>
      %39 = arith.subf %37, %38 : vector<4x1xf32>
      %cst_20 = arith.constant 0.000000e+00 : f32
      %40 = vector.broadcast %cst_20 : f32 to vector<4x1xf32>
      %41 = arith.maximumf %39, %40 : vector<4x1xf32>
      %c0_21 = arith.constant 0 : index
      %c0_22 = arith.constant 0 : index
      %42 = vector.load %arg14[%c0_21, %c0_22] : memref<4x1xf32, #tpu.memory_space<vmem>>, vector<4x1xf32>
      %cst_23 = arith.constant 9.99999974E-6 : f32
      %43 = vector.broadcast %cst_23 : f32 to vector<4x1xf32>
      %44 = arith.addf %41, %43 : vector<4x1xf32>
      %45 = math.rsqrt %44 : vector<4x1xf32>
      %46 = arith.mulf %42, %45 : vector<4x1xf32>
      %c0_24 = arith.constant 0 : index
      %c0_25 = arith.constant 0 : index
      %47 = vector.load %arg31[%c0_24, %c0_25] : memref<4x1xf32, #tpu.memory_space<vmem>>, vector<4x1xf32>
      tpu.vector_store %arg31[%c0_24, %c0_25], %46 {strides = array<i32>} : memref<4x1xf32, #tpu.memory_space<vmem>>, vector<4x1xf32>,
      %c0_26 = arith.constant 0 : index
      %c0_27 = arith.constant 0 : index
      %48 = vector.load %arg15[%c0_26, %c0_27] : memref<4x1xf32, #tpu.memory_space<vmem>>, vector<4x1xf32>
      %49 = arith.mulf %46, %34 : vector<4x1xf32>
      %50 = arith.subf %48, %49 : vector<4x1xf32>
      %c0_28 = arith.constant 0 : index
      %c0_29 = arith.constant 0 : index
      %51 = vector.load %arg32[%c0_28, %c0_29] : memref<4x1xf32, #tpu.memory_space<vmem>>, vector<4x1xf32>
      tpu.vector_store %arg32[%c0_28, %c0_29], %50 {strides = array<i32>} : memref<4x1xf32, #tpu.memory_space<vmem>>, vector<4x1xf32>,
    } else {
    }
    %c3_i32_14 = arith.constant 3 : i32
    %29 = arith.cmpi eq, %arg0, %c3_i32_14 : i32
    %30 = arith.extui %29 : i1 to i32
    %c0_i32_15 = arith.constant 0 : i32
    %31 = arith.cmpi ne, %30, %c0_i32_15 : i32
    scf.if %31 {
      %32 = arith.index_cast %arg1 : i32 to index
      %c0 = arith.constant 0 : index
      %c0_16 = arith.constant 0 : index
      %33 = vector.load %arg35[%32, %c0, %c0_16] : memref<1x4x32xf32, #tpu.memory_space<vmem>>, vector<1x4x32xf32>
      %34 = vector.shape_cast %33 : vector<1x4x32xf32> to vector<4x32xf32>
      %c0_17 = arith.constant 0 : index
      %c0_18 = arith.constant 0 : index
      %35 = vector.load %arg31[%c0_17, %c0_18] : memref<4x1xf32, #tpu.memory_space<vmem>>, vector<4x1xf32>
      %36 = vector.broadcast %35 : vector<4x1xf32> to vector<4x32xf32>
      %37 = arith.mulf %34, %36 : vector<4x32xf32>
      %c0_19 = arith.constant 0 : index
      %c0_20 = arith.constant 0 : index
      %38 = vector.load %arg32[%c0_19, %c0_20] : memref<4x1xf32, #tpu.memory_space<vmem>>, vector<4x1xf32>
      %39 = vector.broadcast %38 : vector<4x1xf32> to vector<4x32xf32>
      %40 = arith.addf %37, %39 : vector<4x32xf32>
      %c0_21 = arith.constant 0 : index
      %c0_22 = arith.constant 0 : index
      %41 = vector.load %arg2[%c0_21, %c0_22] : memref<4x32xf32, #tpu.memory_space<vmem>>, vector<4x32xf32>
      %42 = arith.addf %40, %41 : vector<4x32xf32>
      %c0_23 = arith.constant 0 : index
      %c0_24 = arith.constant 0 : index
      %43 = vector.load %arg20[%c0_23, %c0_24] : memref<4x32xf32, #tpu.memory_space<vmem>>, vector<4x32xf32>
      tpu.vector_store %arg20[%c0_23, %c0_24], %42 {strides = array<i32>} : memref<4x32xf32, #tpu.memory_space<vmem>>, vector<4x32xf32>,
    } else {
    }
    return
  }
  func.func @transform_0(%arg0: i32, %arg1: i32) -> (i32, i32) {
    %c0_i32 = arith.constant 0 : i32
    %0 = arith.cmpi eq, %arg0, %c0_i32 : i32
    %c3_i32 = arith.constant 3 : i32
    %1 = arith.cmpi eq, %arg0, %c3_i32 : i32
    %2 = arith.ori %0, %1 : i1
    %c0_i32_0 = arith.constant 0 : i32
    %3 = arith.select %2, %arg1, %c0_i32_0 : i32
    %c0_i32_1 = arith.constant 0 : i32
    %c0_i32_2 = arith.constant 0 : i32
    return %c0_i32_1, %3 : i32, i32
  }
  func.func @transform_1(%arg0: i32, %arg1: i32) -> (i32, i32) {
    %c0_i32 = arith.constant 0 : i32
    %c0_i32_0 = arith.constant 0 : i32
    %c0_i32_1 = arith.constant 0 : i32
    return %c0_i32, %c0_i32_0 : i32, i32
  }
  func.func @transform_2(%arg0: i32, %arg1: i32) -> (i32, i32) {
    %c0_i32 = arith.constant 0 : i32
    %c0_i32_0 = arith.constant 0 : i32
    %c0_i32_1 = arith.constant 0 : i32
    return %c0_i32, %c0_i32_0 : i32, i32
  }
  func.func @transform_3(%arg0: i32, %arg1: i32) -> (i32, i32) {
    %c0_i32 = arith.constant 0 : i32
    %c0_i32_0 = arith.constant 0 : i32
    %c0_i32_1 = arith.constant 0 : i32
    return %c0_i32, %c0_i32_0 : i32, i32
  }
  func.func @transform_4(%arg0: i32, %arg1: i32) -> (i32, i32) {
    %c0_i32 = arith.constant 0 : i32
    %c0_i32_0 = arith.constant 0 : i32
    %c0_i32_1 = arith.constant 0 : i32
    return %c0_i32, %c0_i32_0 : i32, i32
  }
  func.func @transform_5(%arg0: i32, %arg1: i32) -> (i32, i32) {
    %c0_i32 = arith.constant 0 : i32
    %c0_i32_0 = arith.constant 0 : i32
    %c0_i32_1 = arith.constant 0 : i32
    return %c0_i32, %c0_i32_0 : i32, i32
  }
  func.func @transform_6(%arg0: i32, %arg1: i32) -> (i32, i32) {
    %c0_i32 = arith.constant 0 : i32
    %c0_i32_0 = arith.constant 0 : i32
    %c0_i32_1 = arith.constant 0 : i32
    return %c0_i32, %c0_i32_0 : i32, i32
  }
  func.func @transform_7(%arg0: i32, %arg1: i32) -> (i32, i32) {
    %c0_i32 = arith.constant 0 : i32
    %c0_i32_0 = arith.constant 0 : i32
    %c0_i32_1 = arith.constant 0 : i32
    return %c0_i32, %c0_i32_0 : i32, i32
  }
  func.func @transform_8(%arg0: i32, %arg1: i32) -> (i32, i32) {
    %c0_i32 = arith.constant 0 : i32
    %c0_i32_0 = arith.constant 0 : i32
    %c0_i32_1 = arith.constant 0 : i32
    return %c0_i32, %c0_i32_0 : i32, i32
  }
  func.func @transform_9(%arg0: i32, %arg1: i32) -> (i32, i32) {
    %c0_i32 = arith.constant 0 : i32
    %c0_i32_0 = arith.constant 0 : i32
    %c0_i32_1 = arith.constant 0 : i32
    return %c0_i32, %c0_i32_0 : i32, i32
  }
  func.func @transform_10(%arg0: i32, %arg1: i32) -> (i32, i32) {
    %c0_i32 = arith.constant 0 : i32
    %c0_i32_0 = arith.constant 0 : i32
    %c0_i32_1 = arith.constant 0 : i32
    return %c0_i32, %c0_i32_0 : i32, i32
  }
  func.func @transform_11(%arg0: i32, %arg1: i32) -> (i32, i32) {
    %c0_i32 = arith.constant 0 : i32
    %c0_i32_0 = arith.constant 0 : i32
    %c0_i32_1 = arith.constant 0 : i32
    return %c0_i32, %c0_i32_0 : i32, i32
  }
  func.func @transform_12(%arg0: i32, %arg1: i32) -> (i32, i32) {
    %c0_i32 = arith.constant 0 : i32
    %c0_i32_0 = arith.constant 0 : i32
    %c0_i32_1 = arith.constant 0 : i32
    return %c0_i32, %c0_i32_0 : i32, i32
  }
  func.func @transform_13(%arg0: i32, %arg1: i32) -> (i32, i32) {
    %c0_i32 = arith.constant 0 : i32
    %c0_i32_0 = arith.constant 0 : i32
    %c0_i32_1 = arith.constant 0 : i32
    return %c0_i32, %c0_i32_0 : i32, i32
  }
  func.func @transform_14(%arg0: i32, %arg1: i32) -> (i32, i32) {
    %c0_i32 = arith.constant 0 : i32
    %c0_i32_0 = arith.constant 0 : i32
    %c0_i32_1 = arith.constant 0 : i32
    return %c0_i32, %c0_i32_0 : i32, i32
  }
  func.func @transform_15(%arg0: i32, %arg1: i32) -> (i32, i32) {
    %c0_i32 = arith.constant 0 : i32
    %c0_i32_0 = arith.constant 0 : i32
    %c0_i32_1 = arith.constant 0 : i32
    return %c0_i32, %c0_i32_0 : i32, i32
  }
  func.func @transform_16(%arg0: i32, %arg1: i32) -> (i32, i32) {
    %c0_i32 = arith.constant 0 : i32
    %c0_i32_0 = arith.constant 0 : i32
    %c0_i32_1 = arith.constant 0 : i32
    return %c0_i32, %c0_i32_0 : i32, i32
  }
  func.func @transform_17(%arg0: i32, %arg1: i32) -> (i32, i32) {
    %c0_i32 = arith.constant 0 : i32
    %c0_i32_0 = arith.constant 0 : i32
    %c0_i32_1 = arith.constant 0 : i32
    return %c0_i32, %c0_i32_0 : i32, i32
  }
  func.func @transform_18(%arg0: i32, %arg1: i32) -> (i32, i32) {
    %c3_i32 = arith.constant 3 : i32
    %0 = arith.cmpi eq, %arg0, %c3_i32 : i32
    %c0_i32 = arith.constant 0 : i32
    %1 = arith.select %0, %arg1, %c0_i32 : i32
    %c0_i32_0 = arith.constant 0 : i32
    %c0_i32_1 = arith.constant 0 : i32
    return %c0_i32_0, %1 : i32, i32
  }
}

</mosaic_0001>

<bundles_post_ra>
// kernel: tpu_custom_call.1
= control target key start
LH: loop header
LB: loop body
LE: loop exit
PB: predicated region body
PF: predicated region fallthrough
CT: control target
= control target key end

     0   :  { %s2154_s0 = inlined_call_operand.vmem [shape: f32[4,32], index: 0, kind: input, shape index: {}]   ;;  %s2155_s1 = inlined_call_operand.vmem [shape: f32[16,4], index: 1, kind: input, shape index: {}]   ;;  %s2156_s2 = inlined_call_operand.vmem [shape: f32[16,1], index: 2, kind: input, shape index: {}]   ;;  %s2157_s3 = inlined_call_operand.vmem [shape: f32[16,1], index: 3, kind: input, shape index: {}]   ;;  %s2158_s4 = inlined_call_operand.vmem [shape: f32[16,3], index: 4, kind: input, shape index: {}]   ;;  %s2159_s5 = inlined_call_operand.vmem [shape: f32[16,1], index: 5, kind: input, shape index: {}]   ;;  %s2160_s6 = inlined_call_operand.vmem [shape: f32[16,1], index: 6, kind: input, shape index: {}]   ;;  %s2161_s7 = inlined_call_operand.vmem [shape: f32[4,16], index: 7, kind: input, shape index: {}]   ;;  %s2162_s8 = inlined_call_operand.vmem [shape: f32[4,1], index: 8, kind: input, shape index: {}]   ;;  %s2163_s9 = inlined_call_operand.vmem [shape: f32[16,4], index: 9, kind: input, shape index: {}]   ;;  %s2164_s10 = inlined_call_operand.vmem [shape: f32[16,1], index: 10, kind: input, shape index: {}]   ;;  %s2165_s11 = inlined_call_operand.vmem [shape: f32[4,16], index: 11, kind: input, shape index: {}]   ;;  %s2166_s12 = inlined_call_operand.vmem [shape: f32[4,1], index: 12, kind: input, shape index: {}]   ;;  %s2167_s13 = inlined_call_operand.vmem [shape: f32[4,1], index: 13, kind: input, shape index: {}]   ;;  %s2168_s14 = inlined_call_operand.vmem [shape: f32[2,32], index: 14, kind: input, shape index: {}]   ;;  %s2169_s15 = inlined_call_operand.vmem [shape: f32[32,2], index: 15, kind: input, shape index: {}]   ;;  %s2170_s16 = inlined_call_operand.vmem [shape: f32[1,32], index: 16, kind: input, shape index: {}]   ;;  %s2171_s17 = inlined_call_operand.vmem [shape: f32[1,32], index: 17, kind: input, shape index: {}]   ;;  %s2172_s18 = inlined_call_operand.hbm [shape: f32[4,32], index: 18, kind: output, shape index: {}]  }
   0x1   :  { %2175 = sst [smem:[#allocation20_spill]] %s2154_s0 }
   0x2   :  { %2176 = sst [smem:[#allocation21_spill]] %s2155_s1 }
   0x3   :  { %2177 = sst [smem:[#allocation22_spill]] %s2156_s2 }
   0x4   :  { %2178 = sst [smem:[#allocation23_spill]] %s2157_s3 }
   0x5   :  { %23 = vsyncpa [#allocation18], 0 }
   0x6   :  { %25 = vsyncpa [#allocation18 + $0x1], 0  ;;  %s1980_s27 = smov 0   ;;  %s1982_s28 = smov 0  }
   0x7   :  { %s1984_s29 = smov 0  }
   0x8 LB: > { %s43_s19 = sadd.s32 1, %s1867_s28  ;;  %p1634_p0 = scmp.ge.s32.totalorder %s1871_s29, 1  ;;  %s1871_s29 = sphi %s1984_s29, %s31_s29   ;;  %s1867_s28 = sphi %s1982_s28, %s2188_s28   ;;  %s1863_s27 = sphi %s1980_s27, %s2187_s27  }
   0x9   : > { %p45_p1 = scmp.ge.s32.totalorder %s43_s19, 4  ;;  %p546_p2 = scmp.lt.s32.totalorder %s1871_s29, 5 }
   0xb   : > { %s2190_s19 = smov (%p45_p1, %s43_s19), 0  ;;  %p547_p3 = pnand %p1634_p0, %p546_p2 }
   0xc   : > { %p617_p4 = scmp.eq.s32.totalorder (!%p547_p3), %s1863_s27, 0 }
   0xd   : > { %550 = sbr.rel (%p547_p3) target bundleno = 2503 (0x9c7), region = 92 }
  0x14   : > { %622 = sbr.rel (!%p617_p4) target bundleno = 27 (0x1b), region = 96  ;;  %vm623_vm0 = vcmask (%p617_p4), 7168   ;;  %vm632_vm1 = vcmask (%p617_p4), 3072   ;;  %v1873_v0 = vmov (%p617_p4), 0.0  }
  0x15   : > { %624 = vst.msk [vmem:[#allocation2] sm:$0xff] (%p617_p4), %vm623_vm0, %v1873_v0  ;;  %625 = vst.msk [vmem:[#allocation2 + $0x8] sm:$0xff] (%p617_p4), %vm623_vm0, %v1873_v0 }
  0x16   : > { %626 = vst.msk [vmem:[#allocation3] sm:$0xff] (%p617_p4), %vm623_vm0, %v1873_v0  ;;  %627 = vst.msk [vmem:[#allocation3 + $0x8] sm:$0xff] (%p617_p4), %vm623_vm0, %v1873_v0 }
  0x17   : > { %628 = vst.msk [vmem:[#allocation4] sm:$0xff] (%p617_p4), %vm623_vm0, %v1873_v0  ;;  %629 = vst.msk [vmem:[#allocation4 + $0x8] sm:$0xff] (%p617_p4), %vm623_vm0, %v1873_v0 }
  0x18   : > { %630 = vst.msk [vmem:[#allocation5] sm:$0xff] (%p617_p4), %vm623_vm0, %v1873_v0  ;;  %631 = vst.msk [vmem:[#allocation5 + $0x8] sm:$0xff] (%p617_p4), %vm623_vm0, %v1873_v0 }
  0x19   : > { %633 = vst.msk [vmem:[#allocation6] sm:$0xf] (%p617_p4), %vm632_vm1, %v1873_v0  ;;  %634 = vst.msk [vmem:[#allocation7] sm:$0xf] (%p617_p4), %vm632_vm1, %v1873_v0 }
  0x1b PF: > { %p1636_p5 = scmp.ne.s32.totalorder %s1863_s27, 0 }
  0x1c   : > { %s2179_s21 = sld [smem:[#allocation20_spill]] (!%p1636_p5)  ;;  %vm648_vm2 = vcmask (!%p1636_p5), 1043456   ;;  %s2180_s23 = sld [smem:[#allocation21_spill]] (!%p1636_p5)  ;;  %vm641_vm3 = vcmask (!%p1636_p5), 31744   ;;  %vm729_vm4 = vcmask (!%p1636_p5), 261120   ;;  %v732_v12 = vld [vmem:[#allocation2] sm:$0xff] (!%p1636_p5) }
  0x1d   : > { %637 = sbr.rel (%p1636_p5) target bundleno = 402 (0x192), region = 100  ;;  %vm742_vm5 = vcmask (!%p1636_p5), 7168   ;;  %v745_v14 = vld [vmem:[#allocation3] sm:$0xff] (!%p1636_p5)  ;;  %v733_v17 = vld [vmem:[#allocation2 + $0x8] sm:$0xff] (!%p1636_p5)  ;;  %v746_v20 = vld [vmem:[#allocation3 + $0x8] sm:$0xff] (!%p1636_p5) }
  0x22   : > { %v640_v1 = vld [vmem:[%s2179_s21] sm:$0xf] (!%p1636_p5)  ;;  %v639_v3 = vld [vmem:[%s2180_s23 + $0x8] sm:$0xff] (!%p1636_p5) }
  0x23   : > { %v638_v2 = vld [vmem:[%s2180_s23] sm:$0xff] (!%p1636_p5)  ;;  %1687 = vmatprep.subr.msk.mxu0 (!%p1636_p5), %vm648_vm2, %v640_v1 }
  0x24   : > { %1689 = vmatprep.mubr.msk.f32.mxu0 %vm641_vm3, %v638_v2  ;;  %1688 = vmatpush3.msk.msra.mxu0 %vm648_vm2, %v640_v1 }
  0x25   : > { %1690 = vmatmul.mubr.msk.f32.vlgmr.msra.gmra.mrb[0].mxu0 %vm641_vm3, %v639_v3 }
  0xf8   : > { %v1691_v4 = vpop.f32.mrb[0].mxu0 }
  0xf9   : > { %731 = vst.msk [vmem:[#allocation14 + $0x8] sm:$0xff] %vm729_vm4, %v1691_v4  ;;  %v718_v5 = vpop.f32.mrb[1].mxu0  ;;  %v748_v9 = vmul.f32 %v1691_v4, %v1691_v4  ;;  %v737_v10 = vsel %vm729_vm4, %v1691_v4, 0.0 }
  0xfa   : > { %730 = vst.msk [vmem:[#allocation14] sm:$0xff] %vm729_vm4, %v718_v5  ;;  %v734_v6 = vsel %vm729_vm4, %v718_v5, 0.0  ;;  %v747_v7 = vmul.f32 %v718_v5, %v718_v5 }
  0xfb   : > { %735 = vadd.xlane.f32.xlu0 %v734_v6  ;;  %v752_v11 = vsel %vm729_vm4, %v748_v9, 0.0 }
  0xfc   : > { %v749_v8 = vsel %vm729_vm4, %v747_v7, 0.0 }
  0xfd   : > { %750 = vadd.xlane.f32.xlu1 %v749_v8 }
  0xff   : > { %738 = vadd.xlane.f32.xlu0 %v737_v10 }
 0x101   : > { %753 = vadd.xlane.f32.xlu1 %v752_v11 }
 0x188   : > { %v736_v13 = vpop.xlane.xlu0 %735 }
 0x189   : > { %v740_v15 = vadd.f32 %v736_v13, %v732_v12 }
 0x18a   : > { %v751_v16 = vpop.xlane.xlu1 %750 }
 0x18b   : > { %743 = vst.msk [vmem:[#allocation2] sm:$0xff] %vm742_vm5, %v740_v15  ;;  %v755_v18 = vadd.f32 %v751_v16, %v745_v14 }
 0x18c   : > { %v739_v19 = vpop.xlane.xlu0 %738 }
 0x18d   : > { %757 = vst.msk [vmem:[#allocation3] sm:$0xff] %vm742_vm5, %v755_v18  ;;  %v741_v21 = vadd.f32 %v739_v19, %v733_v17 }
 0x18e   : > { %v754_v22 = vpop.xlane.xlu1 %753 }
 0x18f   : > { %744 = vst.msk [vmem:[#allocation2 + $0x8] sm:$0xff] %vm742_vm5, %v741_v21  ;;  %v756_v23 = vadd.f32 %v754_v22, %v746_v20 }
 0x191   : > { %758 = vst.msk [vmem:[#allocation3 + $0x8] sm:$0xff] %vm742_vm5, %v756_v23 }
 0x192 PF: > { %p759_p6 = scmp.eq.s32.totalorder %s1863_s27, 1 }
 0x193   : > { %v764_v24 = vld [vmem:[#allocation2] sm:$0xff] (%p759_p6)  ;;  %s2181_s20 = sld [smem:[#allocation22_spill]] (%p759_p6)  ;;  %vm786_vm6 = vcmask (%p759_p6), 7168   ;;  %s2182_s3 = sld [smem:[#allocation23_spill]] (%p759_p6) }
 0x194   : > { %763 = sbr.rel (!%p759_p6) target bundleno = 435 (0x1b3), region = 104  ;;  %v768_v25 = vld [vmem:[#allocation3] sm:$0xff] (%p759_p6)  ;;  %v766_v26 = vmul.f32 (%p759_p6), 0.03125, %v764_v24 }
 0x195   : > { %v770_v27 = vmul.f32 (%p759_p6), 0.03125, %v768_v25 }
 0x196   : > { %v765_v28 = vld [vmem:[#allocation2 + $0x8] sm:$0xff] (%p759_p6)  ;;  %v772_v32 = vmul.f32 (%p759_p6), %v766_v26, %v766_v26 }
 0x197   : > { %v767_v30 = vmul.f32 (%p759_p6), 0.03125, %v765_v28 }
 0x198   : > { %v769_v29 = vld [vmem:[#allocation3 + $0x8] sm:$0xff] (%p759_p6)  ;;  %v774_v34 = vsub.f32 (%p759_p6), %v770_v27, %v772_v32 }
 0x199   : > { %v771_v31 = vmul.f32 (%p759_p6), 0.03125, %v769_v29  ;;  %v773_v33 = vmul.f32 (%p759_p6), %v767_v30, %v767_v30  ;;  %v778_v40 = vld [vmem:[%s2181_s20] sm:$0xff] (%p759_p6)  ;;  %v779_v41 = vld [vmem:[%s2181_s20 + $0x8] sm:$0xff] (%p759_p6) }
 0x19a   : > { %v776_v36 = vmax.f32 (%p759_p6), %v774_v34, 0.0  ;;  %v789_v46 = vld [vmem:[%s2182_s3] sm:$0xff] (%p759_p6)  ;;  %v790_v48 = vld [vmem:[%s2182_s3 + $0x8] sm:$0xff] (%p759_p6) }
 0x19b   : > { %v775_v35 = vsub.f32 %v771_v31, %v773_v33 }
 0x19c   : > { %v780_v38 = vadd.f32 1e-05, %v776_v36 }
 0x19d   : > { %v777_v37 = vmax.f32 %v775_v35, 0.0 }
 0x19e   : > { %1788 = vrsqrt.f32 %v780_v38 }
 0x19f   : > { %v781_v39 = vadd.f32 1e-05, %v777_v37 }
 0x1a1   : > { %1790 = vrsqrt.f32 %v781_v39 }
 0x1a8   : > { %v1789_v42 = vpop.eup %1788 }
 0x1a9   : > { %v784_v44 = vmul.f32 %v1789_v42, %v778_v40 }
 0x1ab   : > { %v1791_v43 = vpop.eup %1790  ;;  %787 = vst.msk [vmem:[#allocation8] sm:$0xff] %vm786_vm6, %v784_v44  ;;  %v791_v47 = vmul.f32 %v784_v44, %v766_v26 }
 0x1ac   : > { %v785_v45 = vmul.f32 %v1791_v43, %v779_v41 }
 0x1ad   : > { %v793_v50 = vsub.f32 %v789_v46, %v791_v47 }
 0x1ae   : > { %788 = vst.msk [vmem:[#allocation8 + $0x8] sm:$0xff] %vm786_vm6, %v785_v45  ;;  %v792_v49 = vmul.f32 %v785_v45, %v767_v30 }
 0x1af   : > { %795 = vst.msk [vmem:[#allocation9] sm:$0xff] %vm786_vm6, %v793_v50 }
 0x1b0   : > { %v794_v51 = vsub.f32 %v790_v48, %v792_v49 }
 0x1b2   : > { %796 = vst.msk [vmem:[#allocation9 + $0x8] sm:$0xff] %vm786_vm6, %v794_v51 }
 0x1b3 PF: > { %p1641_p7 = scmp.ne.s32.totalorder %s1863_s27, 1 }
 0x1b4   : > { %v804_v53 = vld [vmem:[#allocation8] sm:$0xff] (!%p1641_p7)  ;;  %v1874_v54 = vmov (!%p1641_p7), 0   ;;  %v862_v58 = vld [vmem:[%s2158_s4] sm:$0xff] (!%p1641_p7)  ;;  %v1875_v59 = vmov (!%p1641_p7), 1   ;;  %v1876_v60 = vmov (!%p1641_p7), 2   ;;  %v802_v61 = vld [vmem:[#allocation14] sm:$0xff] (!%p1641_p7) }
 0x1b5   : > { %799 = sbr.rel (%p1641_p7) target bundleno = 867 (0x363), region = 108  ;;  %1793 = vset.pattern.permute.xlu1 (!%p1641_p7), %v1874_v54  ;;  %1792 = vset.pattern.permute.xlu0 (!%p1641_p7), %v1874_v54  ;;  %v805_v56 = vld [vmem:[#allocation8 + $0x8] sm:$0xff] (!%p1641_p7)  ;;  %v863_v57 = vld [vmem:[%s2158_s4 + $0x8] sm:$0xff] (!%p1641_p7)  ;;  %v803_v1 = vld [vmem:[#allocation14 + $0x8] sm:$0xff] (!%p1641_p7)  ;;  %s1877_s22 = smov (!%p1641_p7), 127   ;;  %vm859_vm7 = vcmask (!%p1641_p7), 252928  }
 0x1b6   : > { %v818_v52 = vld [vmem:[#allocation9] sm:$0xff] (!%p1641_p7)  ;;  %808 = vperm.xlu0 (!%p1641_p7), %1792, %v804_v53   ;;  %s1878_s2 = smov (!%p1641_p7), 1   ;;  %vm850_vm8 = vcmask (!%p1641_p7), 7168   ;;  %v1643_v23 = vld [vmem:[%s2171_s17] ss:$0 sm:$0xff] (!%p1641_p7)  ;;  %vm919_vm9 = vcmask (!%p1641_p7), 261120  }
 0x1b7   : > { %822 = vperm.xlu1 (!%p1641_p7), %1793, %v818_v52   ;;  %v1642_v24 = vld [vmem:[%s2170_s16] ss:$0 sm:$0xff] (!%p1641_p7) }
 0x1b8   : > { %v922_v53 = vld [vmem:[#allocation4] sm:$0xff] (!%p1641_p7) }
 0x1b9   : > { %v819_v55 = vld [vmem:[#allocation9 + $0x8] sm:$0xff] (!%p1641_p7) }
 0x1ba   : > { %813 = vperm.xlu0 (!%p1641_p7), %1792, %v805_v56   ;;  %v934_v56 = vld [vmem:[#allocation5] sm:$0xff] (!%p1641_p7) }
 0x1bb   : > { %827 = vperm.xlu1 (!%p1641_p7), %1793, %v819_v55  }
 0x1be   : > { %875 = vperm.xlu0 %1792, %v862_v58  }
 0x1bf   : > { %880 = vperm.xlu1 %1793, %v863_v57  }
 0x1c2   : > { %1794 = vset.pattern.permute.xlu0 %v1875_v59 }
 0x1c3   : > { %1795 = vset.pattern.permute.xlu1 %v1875_v59  ;;  %886 = vperm.xlu0 %1794, %v862_v58  }
 0x1c4   : > { %890 = vperm.xlu1 %1795, %v863_v57  }
 0x1c7   : > { %1797 = vset.pattern.permute.xlu0 %v1876_v60 }
 0x1c8   : > { %1796 = vset.pattern.permute.xlu1 %v1876_v60  ;;  %911 = vperm.xlu0 %1797, %v863_v57  }
 0x1c9   : > { %907 = vperm.xlu1 %1796, %v862_v58   ;;  %v923_v58 = vld [vmem:[#allocation4 + $0x8] sm:$0xff] }
 0x235   : > { %v809_v63 = vpop.permute.xlu0 %808 }
 0x236   : > { %v823_v62 = vpop.permute.xlu1 %822  ;;  %v816_v0 = vmul.f32 %v809_v63, %v802_v61  ;;  %v935_v61 = vld [vmem:[#allocation5 + $0x8] sm:$0xff] }
 0x238   : > { %v830_v2 = vadd.f32 %v823_v62, %v816_v0 }
 0x239   : > { %v814_v3 = vpop.permute.xlu0 %813 }
 0x23a   : > { %v832_v4 = vmul.f32 0.5, %v830_v2  ;;  %v817_v5 = vmul.f32 %v814_v3, %v803_v1  ;;  %v828_v6 = vpop.permute.xlu1 %827 }
 0x23c   : > { %1798 = vtanh.f32 %v832_v4  ;;  %v831_v7 = vadd.f32 %v828_v6, %v817_v5 }
 0x23d   : > { %v876_v18 = vpop.permute.xlu0 %875 }
 0x23e   : > { %v833_v8 = vmul.f32 0.5, %v831_v7  ;;  %v881_v17 = vpop.permute.xlu1 %880 }
 0x240   : > { %1800 = vtanh.f32 %v833_v8 }
 0x242   : > { %v887_v19 = vpop.permute.xlu0 %886 }
 0x243   : > { %v891_v20 = vpop.permute.xlu1 %890 }
 0x246   : > { %v1799_v9 = vpop.eup %1798 }
 0x247   : > { %v836_v10 = vadd.f32 1.0, %v1799_v9  ;;  %v912_v22 = vpop.permute.xlu0 %911 }
 0x248   : > { %v908_v21 = vpop.permute.xlu1 %907 }
 0x249   : > { %v838_v11 = vmul.f32 0.5, %v836_v10 }
 0x24a   : > { %v1801_v12 = vpop.eup %1800 }
 0x24b   : > { %v840_v13 = vmul.f32 %v838_v11, %v830_v2  ;;  %v837_v14 = vadd.f32 1.0, %v1801_v12 }
 0x24d   : > { %v839_v15 = vmul.f32 0.5, %v837_v14  ;;  %853 = vrot.lane.b32.xlu0 %v840_v13, %s1877_s22  ;;  %844 = vrot.lane.b32.xlu1 %v840_v13, %s1878_s2  ;;  %v893_v31 = vmul.f32 %v887_v19, %v840_v13 }
 0x24f   : > { %v841_v16 = vmul.f32 %v839_v15, %v831_v7 }
 0x251   : > { %846 = vrot.lane.b32.xlu1 %v841_v16, %s1878_s2  ;;  %v894_v42 = vmul.f32 %v891_v20, %v841_v16 }
 0x255   : > { %855 = vrot.lane.b32.xlu1 %v841_v16, %s1877_s22 }
 0x2bf   : > { %v854_v25 = vpop.permute.xlu0 %853  ;;  %v845_v26 = vpop.permute.xlu1 %844 }
 0x2c0   : > { %v860_v27 = vsel %vm859_vm7, %v854_v25, %v840_v13  ;;  %v851_v28 = vsel %vm850_vm8, %v840_v13, %v845_v26 }
 0x2c1   : > { %v904_v29 = vmul.f32 %v1643_v23, %v860_v27  ;;  %v871_v30 = vmul.f32 %v1642_v24, %v851_v28 }
 0x2c3   : > { %v883_v32 = vmul.f32 %v876_v18, %v871_v30  ;;  %v847_v33 = vpop.permute.xlu1 %846  ;;  %v914_v35 = vmul.f32 %v908_v21, %v904_v29 }
 0x2c4   : > { %v852_v34 = vsel %vm850_vm8, %v841_v16, %v847_v33 }
 0x2c5   : > { %v895_v36 = vadd.f32 %v893_v31, %v883_v32  ;;  %v872_v37 = vmul.f32 %v1642_v24, %v852_v34 }
 0x2c7   : > { %v884_v38 = vmul.f32 %v881_v17, %v872_v37  ;;  %v856_v39 = vpop.permute.xlu1 %855  ;;  %v916_v40 = vadd.f32 %v914_v35, %v895_v36 }
 0x2c8   : > { %v861_v41 = vsel %vm859_vm7, %v856_v39, %v841_v16 }
 0x2c9   : > { %v905_v43 = vmul.f32 %v1643_v23, %v861_v41  ;;  %v924_v44 = vsel %vm919_vm9, %v916_v40, 0.0  ;;  %920 = vst.msk [vmem:[#allocation15] sm:$0xff] %vm919_vm9, %v916_v40  ;;  %v936_v45 = vmul.f32 %v916_v40, %v916_v40  ;;  %v896_v46 = vadd.f32 %v894_v42, %v884_v38 }
 0x2ca   : > { %925 = vadd.xlane.f32.xlu0 %v924_v44 }
 0x2cb   : > { %v915_v47 = vmul.f32 %v912_v22, %v905_v43  ;;  %v938_v48 = vsel %vm919_vm9, %v936_v45, 0.0 }
 0x2cd   : > { %v917_v49 = vadd.f32 %v915_v47, %v896_v46 }
 0x2ce   : > { %939 = vadd.xlane.f32.xlu0 %v938_v48 }
 0x2cf   : > { %v927_v50 = vsel %vm919_vm9, %v917_v49, 0.0  ;;  %921 = vst.msk [vmem:[#allocation15 + $0x8] sm:$0xff] %vm919_vm9, %v917_v49  ;;  %v937_v51 = vmul.f32 %v917_v49, %v917_v49 }
 0x2d0   : > { %928 = vadd.xlane.f32.xlu1 %v927_v50 }
 0x2d1   : > { %v941_v52 = vsel %vm919_vm9, %v937_v51, 0.0 }
 0x2d2   : > { %942 = vadd.xlane.f32.xlu0 %v941_v52 }
 0x357   : > { %v926_v54 = vpop.xlane.xlu0 %925 }
 0x358   : > { %v930_v55 = vadd.f32 %v926_v54, %v922_v53 }
 0x35a   : > { %932 = vst.msk [vmem:[#allocation4] sm:$0xff] %vm850_vm8, %v930_v55 }
 0x35b   : > { %v940_v57 = vpop.xlane.xlu0 %939 }
 0x35c   : > { %v944_v59 = vadd.f32 %v940_v57, %v934_v56 }
 0x35d   : > { %v929_v60 = vpop.xlane.xlu1 %928 }
 0x35e   : > { %946 = vst.msk [vmem:[#allocation5] sm:$0xff] %vm850_vm8, %v944_v59  ;;  %v931_v62 = vadd.f32 %v929_v60, %v923_v58 }
 0x35f   : > { %v943_v63 = vpop.xlane.xlu0 %942 }
 0x360   : > { %933 = vst.msk [vmem:[#allocation4 + $0x8] sm:$0xff] %vm850_vm8, %v931_v62  ;;  %v945_v0 = vadd.f32 %v943_v63, %v935_v61 }
 0x362   : > { %947 = vst.msk [vmem:[#allocation5 + $0x8] sm:$0xff] %vm850_vm8, %v945_v0 }
 0x363 PF: > { %p948_p8 = scmp.eq.s32.totalorder %s1863_s27, 2 }
 0x364   : > { %v953_v1 = vld [vmem:[#allocation4] sm:$0xff] (%p948_p8)  ;;  %v968_v18 = vld [vmem:[%s2159_s5 + $0x8] sm:$0xff] (%p948_p8)  ;;  %vm975_vm10 = vcmask (%p948_p8), 7168  }
 0x365   : > { %952 = sbr.rel (!%p948_p8) target bundleno = 900 (0x384), region = 112  ;;  %v957_v2 = vld [vmem:[#allocation5] sm:$0xff] (%p948_p8)  ;;  %v955_v3 = vmul.f32 (%p948_p8), 0.03125, %v953_v1  ;;  %v967_v17 = vld [vmem:[%s2159_s5] sm:$0xff] (%p948_p8)  ;;  %v979_v25 = vld [vmem:[%s2160_s6 + $0x8] sm:$0xff] (%p948_p8) }
 0x366   : > { %v959_v4 = vmul.f32 (%p948_p8), 0.03125, %v957_v2  ;;  %v978_v23 = vld [vmem:[%s2160_s6] sm:$0xff] (%p948_p8) }
 0x367   : > { %v954_v5 = vld [vmem:[#allocation4 + $0x8] sm:$0xff] (%p948_p8)  ;;  %v961_v9 = vmul.f32 (%p948_p8), %v955_v3, %v955_v3 }
 0x368   : > { %v956_v7 = vmul.f32 (%p948_p8), 0.03125, %v954_v5 }
 0x369   : > { %v958_v6 = vld [vmem:[#allocation5 + $0x8] sm:$0xff] (%p948_p8)  ;;  %v963_v11 = vsub.f32 (%p948_p8), %v959_v4, %v961_v9 }
 0x36a   : > { %v960_v8 = vmul.f32 (%p948_p8), 0.03125, %v958_v6  ;;  %v962_v10 = vmul.f32 (%p948_p8), %v956_v7, %v956_v7 }
 0x36b   : > { %v965_v13 = vmax.f32 (%p948_p8), %v963_v11, 0.0 }
 0x36c   : > { %v964_v12 = vsub.f32 %v960_v8, %v962_v10 }
 0x36d   : > { %v969_v15 = vadd.f32 1e-05, %v965_v13 }
 0x36e   : > { %v966_v14 = vmax.f32 %v964_v12, 0.0 }
 0x36f   : > { %1802 = vrsqrt.f32 %v969_v15 }
 0x370   : > { %v970_v16 = vadd.f32 1e-05, %v966_v14 }
 0x372   : > { %1804 = vrsqrt.f32 %v970_v16 }
 0x379   : > { %v1803_v19 = vpop.eup %1802 }
 0x37a   : > { %v973_v21 = vmul.f32 %v1803_v19, %v967_v17 }
 0x37c   : > { %v1805_v20 = vpop.eup %1804  ;;  %976 = vst.msk [vmem:[#allocation10] sm:$0xff] %vm975_vm10, %v973_v21  ;;  %v980_v24 = vmul.f32 %v973_v21, %v955_v3 }
 0x37d   : > { %v974_v22 = vmul.f32 %v1805_v20, %v968_v18 }
 0x37e   : > { %v982_v27 = vsub.f32 %v978_v23, %v980_v24 }
 0x37f   : > { %977 = vst.msk [vmem:[#allocation10 + $0x8] sm:$0xff] %vm975_vm10, %v974_v22  ;;  %v981_v26 = vmul.f32 %v974_v22, %v956_v7 }
 0x380   : > { %984 = vst.msk [vmem:[#allocation11] sm:$0xff] %vm975_vm10, %v982_v27 }
 0x381   : > { %v983_v28 = vsub.f32 %v979_v25, %v981_v26 }
 0x383   : > { %985 = vst.msk [vmem:[#allocation11 + $0x8] sm:$0xff] %vm975_vm10, %v983_v28 }
 0x384 PF: > { %p1645_p9 = scmp.ne.s32.totalorder %s1863_s27, 2 }
 0x385   : > { %v993_v30 = vld [vmem:[#allocation10] sm:$0xff] (!%p1645_p9)  ;;  %v1879_v31 = vmov (!%p1645_p9), 0   ;;  %v1201_v34 = vld [vmem:[%s2164_s10] sm:$0xff] (!%p1645_p9)  ;;  %v1033_v40 = vld [vmem:[%s2169_s15 + $0x10] sm:$0xff] (!%p1645_p9)  ;;  %vm1035_vm11 = vcmask (!%p1645_p9), 261120   ;;  %v1880_v63 = vmov (!%p1645_p9), 0.0|0.0  }
 0x386   : > { %988 = sbr.rel (%p1645_p9) target bundleno = 2307 (0x903), region = 116  ;;  %1807 = vset.pattern.permute.xlu1 (!%p1645_p9), %v1879_v31  ;;  %1806 = vset.pattern.permute.xlu0 (!%p1645_p9), %v1879_v31  ;;  %v994_v33 = vld [vmem:[#allocation10 + $0x8] sm:$0xff] (!%p1645_p9)  ;;  %v1118_v35 = vld [vmem:[%s2162_s8] sm:$0xf] (!%p1645_p9)  ;;  %v1202_v36 = vld [vmem:[%s2164_s10 + $0x8] sm:$0xff] (!%p1645_p9)  ;;  %vm1881_vm12 = vmmov (!%p1645_p9), 0  }
 0x387   : > { %v1007_v29 = vld [vmem:[#allocation11] sm:$0xff] (!%p1645_p9)  ;;  %997 = vperm.xlu0 (!%p1645_p9), %1806, %v993_v30   ;;  %v1031_v37 = vld [vmem:[%s2169_s15] sm:$0xff] (!%p1645_p9)  ;;  %v1032_v38 = vld [vmem:[%s2169_s15 + $0x8] sm:$0xff] (!%p1645_p9)  ;;  %1735 = vmatprep.subr.bf16.mxu1 (!%p1645_p9), %v1880_v63  ;;  %v1882_v0 = vmov (!%p1645_p9), 0.0   ;;  %vm1124_vm13 = vcmask (!%p1645_p9), 130048   ;;  %vm1213_vm14 = vcmask (!%p1645_p9), 31744  }
 0x388   : > { %1011 = vperm.xlu1 (!%p1645_p9), %1807, %v1007_v29   ;;  %v1727_v39 = vpack.c.bf16 (!%p1645_p9), %v1032_v38, %v1031_v37  ;;  %v1034_v41 = vld [vmem:[%s2169_s15 + $0x18] sm:$0xff] (!%p1645_p9)  ;;  %v991_v43 = vld [vmem:[#allocation15] sm:$0xff] (!%p1645_p9)  ;;  %v992_v47 = vld [vmem:[#allocation15 + $0x8] sm:$0xff] (!%p1645_p9)  ;;  %1707 = vmatprep.mubr.msk.f32.mxu1 (!%p1645_p9), %vm1881_vm12, %v1882_v0  ;;  %vm1220_vm15 = vcmask (!%p1645_p9), 1043456   ;;  %vm1315_vm0 = vcmask (!%p1645_p9), 1041408   ;;  %vm1308_vm1 = vcmask (!%p1645_p9), 15360  }
 0x389   : > { %v1731_v42 = vpack.c.bf16 (!%p1645_p9), %v1034_v41, %v1033_v40  ;;  %v1117_v4 = vld [vmem:[%s2161_s7] sm:$0xf] (!%p1645_p9)  ;;  %v1200_v11 = vld [vmem:[%s2163_s9 + $0x8] sm:$0xff] (!%p1645_p9)  ;;  %vm1472_vm2 = vcmask (!%p1645_p9), 257024   ;;  %vm1479_vm3 = vcmask (!%p1645_p9), 3072  }
 0x38a   : > { %v1008_v32 = vld [vmem:[#allocation11 + $0x8] sm:$0xff] (!%p1645_p9)  ;;  %1728 = vmatprep.subr.bf16.mxu0 (!%p1645_p9), %v1727_v39 }
 0x38b   : > { %1002 = vperm.xlu0 (!%p1645_p9), %1806, %v994_v33   ;;  %1730 = vmatpush3.bf16.msra.mxu0 (!%p1645_p9), %v1727_v39  ;;  %v1199_v5 = vld [vmem:[%s2163_s9] sm:$0xff] (!%p1645_p9) }
 0x38c   : > { %1016 = vperm.xlu1 (!%p1645_p9), %1807, %v1008_v32   ;;  %1732 = vmatprep.subr.bf16.mxu0 (!%p1645_p9), %v1731_v42  ;;  %v1307_v12 = vld [vmem:[%s2168_s14] sm:$0x3] (!%p1645_p9)  ;;  %v1481_v40 = vld [vmem:[#allocation7] sm:$0xf] (!%p1645_p9) }
 0x38d   : > { %v1396_v32 = vld [vmem:[%s2165_s11] sm:$0xf] }
 0x38e   : > { %v1474_v38 = vld [vmem:[#allocation6] sm:$0xf] }
 0x38f   : > { %1121 = vperm.xlu0 %1806, %v1118_v35   ;;  %1734 = vmatpush3.bf16.msra.mxu0 %v1731_v42 }
 0x390   : > { %1205 = vperm.xlu1 %1807, %v1201_v34   ;;  %1715 = vmatprep.subr.msk.mxu0 %vm1315_vm0, %v1307_v12 }
 0x393   : > { %1210 = vperm.xlu0 %1806, %v1202_v36  }
 0x406   : > { %v998_v45 = vpop.permute.xlu0 %997 }
 0x407   : > { %v1012_v44 = vpop.permute.xlu1 %1011  ;;  %v1005_v46 = vmul.f32 %v998_v45, %v991_v43 }
 0x409   : > { %v1019_v48 = vadd.f32 %v1012_v44, %v1005_v46 }
 0x40a   : > { %v1003_v49 = vpop.permute.xlu0 %1002 }
 0x40b   : > { %v1021_v50 = vmul.f32 0.5, %v1019_v48  ;;  %v1006_v51 = vmul.f32 %v1003_v49, %v992_v47  ;;  %v1017_v52 = vpop.permute.xlu1 %1016 }
 0x40d   : > { %1808 = vtanh.f32 %v1021_v50  ;;  %v1020_v53 = vadd.f32 %v1017_v52, %v1006_v51 }
 0x40e   : > { %v1122_v6 = vpop.permute.xlu0 %1121 }
 0x40f   : > { %v1022_v54 = vmul.f32 0.5, %v1020_v53  ;;  %v1206_v15 = vpop.permute.xlu1 %1205 }
 0x411   : > { %1810 = vtanh.f32 %v1022_v54 }
 0x412   : > { %v1211_v13 = vpop.permute.xlu0 %1210 }
 0x417   : > { %v1809_v55 = vpop.eup %1808 }
 0x418   : > { %v1025_v56 = vadd.f32 1.0, %v1809_v55 }
 0x41a   : > { %v1027_v57 = vmul.f32 0.5, %v1025_v56 }
 0x41b   : > { %v1811_v58 = vpop.eup %1810 }
 0x41c   : > { %v1026_v59 = vadd.f32 1.0, %v1811_v58  ;;  %v1029_v60 = vmul.f32 %v1027_v57, %v1019_v48 }
 0x41e   : > { %v1028_v61 = vmul.f32 0.5, %v1026_v59  ;;  %1700 = vmatprep.mubr.msk.f32.mxu0 %vm1035_vm11, %v1029_v60 }
 0x420   : > { %v1030_v62 = vmul.f32 %v1028_v61, %v1020_v53 }
 0x422   : > { %1701 = vmatmul.mubr.msk.f32.vlgmr.msra.gmra.mrb[0].mxu0 %vm1035_vm11, %v1030_v62 }
 0x423   : > { %1716 = vmatpush3.msk.msra.mxu0 %vm1315_vm0, %v1307_v12 }
 0x4f5   : > { %v1702_v1 = vpop.f32.mrb[0].mxu0 }
 0x4f6   : > { %v1108_v2 = vpop.f32.mrb[1].mxu0 }
 0x4f7   : > { %v1736_v3 = vpack.c.bf16 %v1702_v1, %v1108_v2 }
 0x4f9   : > { %1737 = vmatpush3.bf16.msra.mxu1 %v1736_v3 }
 0x4fc   : > { %1708 = vmatmul.mubr.msk.f32.vlgmr.msra.gmra.mrb[0].mxu1 %vm1124_vm13, %v1117_v4 }
 0x4fd   : > { %1712 = vmatprep.mubr.msk.f32.mxu1 %vm1213_vm14, %v1199_v5 }
 0x5cf   : > { %v1194_v7 = vpop.f32.mrb[0].mxu1 }
 0x5d0   : > { %v1195_v8 = vadd.f32 %v1194_v7, %v1122_v6  ;;  %v1709_v9 = vpop.f32.mrb[1].mxu1 }
 0x5d2   : > { %v1198_v10 = vmax.f32 %v1195_v8, 0.0 }
 0x5d4   : > { %1710 = vmatprep.subr.msk.mxu1 %vm1220_vm15, %v1198_v10 }
 0x5d5   : > { %1711 = vmatpush3.msk.msra.mxu1 %vm1220_vm15, %v1198_v10 }
 0x5d6   : > { %1713 = vmatmul.mubr.msk.f32.vlgmr.msra.gmra.mrb[2].mxu1 %vm1213_vm14, %v1200_v11  ;;  %1738 = vmatprep.subr.bf16.mxu1 %v1880_v63 }
 0x5d7   : > { %1724 = vmatprep.mubr.msk.f32.mxu1 %vm1881_vm12, %v1882_v0 }
 0x6a9   : > { %v1714_v14 = vpop.f32.mrb[2].mxu1 }
 0x6aa   : > { %v1296_v16 = vadd.f32 %v1714_v14, %v1211_v13  ;;  %v1290_v17 = vpop.f32.mrb[3].mxu1 }
 0x6ab   : > { %v1291_v18 = vadd.f32 %v1290_v17, %v1206_v15 }
 0x6ac   : > { %v1300_v19 = vmul.f32 0.5, %v1296_v16 }
 0x6ad   : > { %v1299_v20 = vmul.f32 0.5, %v1291_v18 }
 0x6ae   : > { %1812 = vtanh.f32 %v1300_v19 }
 0x6af   : > { %1814 = vtanh.f32 %v1299_v20 }
 0x6b8   : > { %v1813_v21 = vpop.eup %1812 }
 0x6b9   : > { %v1815_v22 = vpop.eup %1814  ;;  %v1304_v23 = vadd.f32 1.0, %v1813_v21 }
 0x6ba   : > { %v1303_v24 = vadd.f32 1.0, %v1815_v22 }
 0x6bb   : > { %v1306_v26 = vmul.f32 0.5, %v1304_v23 }
 0x6bc   : > { %v1305_v25 = vmul.f32 0.5, %v1303_v24 }
 0x6be   : > { %1717 = vmatprep.mubr.msk.f32.mxu0 %vm1308_vm1, %v1305_v25 }
 0x6bf   : > { %1718 = vmatmul.mubr.msk.f32.vlgmr.msra.gmra.mrb[2].mxu0 %vm1308_vm1, %v1306_v26 }
 0x792   : > { %v1719_v27 = vpop.f32.mrb[2].mxu0 }
 0x793   : > { %v1395_v28 = vmul.f32 %v1719_v27, %v1030_v62  ;;  %v1385_v29 = vpop.f32.mrb[3].mxu0 }
 0x794   : > { %v1394_v30 = vmul.f32 %v1385_v29, %v1029_v60 }
 0x796   : > { %v1739_v31 = vpack.c.bf16 %v1395_v28, %v1394_v30 }
 0x798   : > { %1740 = vmatpush3.bf16.msra.mxu1 %v1739_v31 }
 0x79b   : > { %1725 = vmatmul.mubr.msk.f32.vlgmr.msra.gmra.mrb[4].mxu1 %vm1124_vm13, %v1396_v32 }
 0x86e   : > { %v1466_v33 = vpop.f32.mrb[4].mxu1 }
 0x86f   : > { %v1726_v34 = vpop.f32.mrb[5].mxu1  ;;  %v1475_v35 = vsel %vm1472_vm2, %v1466_v33, 0.0  ;;  %1473 = vst.msk [vmem:[#allocation16] sm:$0xf] %vm1472_vm2, %v1466_v33  ;;  %v1482_v36 = vmul.f32 %v1466_v33, %v1466_v33 }
 0x870   : > { %1476 = vadd.xlane.f32.xlu1 %v1475_v35 }
 0x871   : > { %v1483_v37 = vsel %vm1472_vm2, %v1482_v36, 0.0 }
 0x872   : > { %1484 = vadd.xlane.f32.xlu0 %v1483_v37 }
 0x8fd   : > { %v1477_v39 = vpop.xlane.xlu1 %1476 }
 0x8fe   : > { %v1478_v41 = vadd.f32 %v1477_v39, %v1474_v38 }
 0x8ff   : > { %v1485_v42 = vpop.xlane.xlu0 %1484 }
 0x900   : > { %1480 = vst.msk [vmem:[#allocation6] sm:$0xf] %vm1479_vm3, %v1478_v41  ;;  %v1486_v43 = vadd.f32 %v1485_v42, %v1481_v40 }
 0x902   : > { %1487 = vst.msk [vmem:[#allocation7] sm:$0xf] %vm1479_vm3, %v1486_v43 }
 0x903 PF: > { %p1488_p10 = scmp.eq.s32.totalorder %s1863_s27, 3 }
 0x904   : > { %v1500_v52 = vld [vmem:[%s2166_s12] sm:$0xf] (%p1488_p10)  ;;  %vm1504_vm4 = vcmask (%p1488_p10), 3072  }
 0x905   : > { %1492 = sbr.rel (!%p1488_p10) target bundleno = 2340 (0x924), region = 120  ;;  %v1506_v55 = vld [vmem:[%s2167_s13] sm:$0xf] (%p1488_p10) }
 0x907   : > { %v1493_v44 = vld [vmem:[#allocation6] sm:$0xf] (%p1488_p10) }
 0x908   : > { %v1494_v46 = vmul.f32 (%p1488_p10), 0.03125, %v1493_v44 }
 0x909   : > { %v1495_v45 = vld [vmem:[#allocation7] sm:$0xf] (%p1488_p10) }
 0x90a   : > { %v1496_v47 = vmul.f32 (%p1488_p10), 0.03125, %v1495_v45  ;;  %v1497_v48 = vmul.f32 (%p1488_p10), %v1494_v46, %v1494_v46 }
 0x90c   : > { %v1498_v49 = vsub.f32 %v1496_v47, %v1497_v48 }
 0x90e   : > { %v1499_v50 = vmax.f32 %v1498_v49, 0.0 }
 0x910   : > { %v1501_v51 = vadd.f32 1e-05, %v1499_v50 }
 0x912   : > { %1816 = vrsqrt.f32 %v1501_v51 }
 0x91c   : > { %v1817_v53 = vpop.eup %1816 }
 0x91d   : > { %v1503_v54 = vmul.f32 %v1817_v53, %v1500_v52 }
 0x91f   : > { %1505 = vst.msk [vmem:[#allocation12] sm:$0xf] %vm1504_vm4, %v1503_v54  ;;  %v1507_v56 = vmul.f32 %v1503_v54, %v1494_v46 }
 0x921   : > { %v1508_v57 = vsub.f32 %v1506_v55, %v1507_v56 }
 0x923   : > { %1509 = vst.msk [vmem:[#allocation13] sm:$0xf] %vm1504_vm4, %v1508_v57 }
 0x924 PF: > { %p1657_p11 = scmp.ne.s32.totalorder %s1863_s27, 3 }
 0x925   : > { %v1883_v59 = vmov (!%p1657_p11), 0   ;;  %v1515_v62 = vld [vmem:[#allocation16] sm:$0xf] (!%p1657_p11)  ;;  %s2183_s1 = sld [smem:[#allocation20_spill]] (!%p1657_p11)  ;;  %vm1532_vm5 = vcmask (!%p1657_p11), 257024  }
 0x926   : > { %1512 = sbr.rel (%p1657_p11) target bundleno = 2480 (0x9b0), region = 124  ;;  %v1516_v58 = vld [vmem:[#allocation12] sm:$0xf] (!%p1657_p11)  ;;  %1818 = vset.pattern.permute.xlu0 (!%p1657_p11), %v1883_v59 }
 0x927   : > { %1519 = vperm.xlu0 (!%p1657_p11), %1818, %v1516_v58  }
 0x92a   : > { %v1523_v60 = vld [vmem:[#allocation13] sm:$0xf] (!%p1657_p11) }
 0x92b   : > { %1526 = vperm.xlu0 (!%p1657_p11), %1818, %v1523_v60   ;;  %v1530_v0 = vld [vmem:[%s2183_s1] sm:$0xf] (!%p1657_p11) }
 0x9a6   : > { %v1520_v61 = vpop.permute.xlu0 %1519 }
 0x9a7   : > { %v1522_v63 = vmul.f32 %v1520_v61, %v1515_v62 }
 0x9aa   : > { %v1527_v1 = vpop.permute.xlu0 %1526 }
 0x9ab   : > { %v1529_v2 = vadd.f32 %v1527_v1, %v1522_v63 }
 0x9ad   : > { %v1531_v3 = vadd.f32 %v1530_v0, %v1529_v2 }
 0x9af   : > { %1533 = vst.msk [vmem:[#allocation17] sm:$0xf] %vm1532_vm5, %v1531_v3 }
 0x9b0 PF: > { %s2184_s27 = sadd.s32 4294967295, %s1871_s29   ;;  %s1884_s22 = smov [#allocation17]  }
 0x9b1   : > { %p2120_p12 = scmp.eq.s32.totalorder %s2184_s27, 3  ;;  %s1550_s2 = sshll.u32 %s1884_s22, 4  ;;  %s1551_s2 = int_to_ptr.vmem [resolvable:$true] %s1550_s2 }
 0x9b2   : > { %s1819_s3 = scalar_lea.vmem %s1551_s2, 64  ;;  %s1825_s30 = scalar_lea.vmem %s1551_s2, 128 }
 0x9b3   : > { %p1820_p13 = scmp.ne.s32.totalorder %s1551_s2, %s1819_s3  ;;  %p1826_p2 = scmp.lt.s32.totalorder %s1551_s2, %s1551_s2 }
 0x9b4   : > { %p1827_p3 = scmp.lt.s32.totalorder %s1825_s30, %s1819_s3 }
 0x9b5   : > { %p1821_p0 = pnand %p1820_p13, %p2120_p12 }
 0x9b6   : > { %p1828_p4 = por %p1827_p3, %p1826_p2 }
 0x9b7   : > { %p1822_p1 = pneg %p1821_p0 }
 0x9b9   : > { %p1829_p5 = pnand %p1828_p4, %p1822_p1 }
 0x9bb   : > { %1832 = shalt.err (!%p1829_p5)
}
 0x9bc   : > { %s1833_s0 = scalar_lea.hbm %s2172_s18, 64 }
 0x9bd   : > { %p1834_p6 = scmp.ne.s32.totalorder %s2172_s18, %s1833_s0  ;;  %p1839_p9 = scmp.lt.u32.totalorder %s1833_s0, %s2172_s18 }
 0x9bf   : > { %p1835_p7 = pnand %p1834_p6, %p2120_p12 }
 0x9c1   : > { %p1836_p8 = pneg %p1835_p7 }
 0x9c3   : > { %p1841_p10 = pnand %p1839_p9, %p1836_p8 }
 0x9c5   : > { %1844 = shalt.err (!%p1841_p10)
}
 0x9c6   : > { %1742 = dma.vmem_to_hbm [thread:$0]  (%p2120_p12), %s1551_s2, 64, %s2172_s18, [#allocation18]  }
 0x9c7 PF: > { %p1750_p11 = scmp.ge.s32.totalorder %s1871_s29, 2  ;;  %s2186_s24 = sadd.s32 4294967294, %s1871_s29  }
 0x9c8   : > { %p1751_p13 = scmp.eq.s32.totalorder %s2186_s24, 3 }
 0x9ca   : > { %p1746_p0 = pnand %p1751_p13, %p1750_p11 }
 0x9cc   : > { %1858 = dma.done.wait (!%p1746_p0), [#allocation18], 64  }
 0x9cd   : > { %1860 = vsyncadd (!%p1746_p0), [#allocation18], 4294967232  ;;  %s31_s29 = sadd.s32 1, %s1871_s29   ;;  %s2187_s27 = smov %s1867_s28 }
 0x9ce   : > { %p28_p1 = scmp.ge.s32.totalorder %s31_s29, 6   ;;  %s2188_s28 = smov %s2190_s19 }
 0x9d0   :  { %30 = sbr.rel (!%p28_p1) target bundleno = 8 (0x8), region = 165 }
 0x9d7   :  { %1568 = vsyncpa [#allocation18], 1 }
 0x9d8   :  { %1570 = vsyncpa [#allocation18 + $0x1], 1 }

</bundles_post_ra>
